<compile_context>
chip_gen: v5e
topology: v5e:2x2
jax: 0.10.0
libtpu: 0.0.40
codegen_flags: <defaults>
</compile_context>

<pallas_src>
import functools

import numpy as np

import jax
import jax.numpy as jnp
from jax import lax
from jax.experimental import pallas as pl
from jax.experimental.pallas import tpu as pltpu

ROI_CROP_RATIO = 0.3
CONV_K = 3        # StaticSizeCNN conv kernel size
CONV_STRIDE = 2   # StaticSizeCNN conv stride
CONV_PAD = 1      # StaticSizeCNN conv padding
_LANE = 128
_SUBLANE = 8


def _round_up(x, m):
    return ((x + m - 1) // m) * m


# ----------------------------------------------------------------------------
# Pallas kernel: the ENTIRE StaticSizeCNN forward, fused into one launch.
# ----------------------------------------------------------------------------
def _fused_cnn_kernel(x_ref, wband_ref, b1_ref, wb_ref, bb_ref,
                      wc_ref, bc_ref, wd_ref, bd_ref, o_ref,
                      *, h1, slab_stride, band_k):
    """conv1 (banded) -> conv2 (folded) -> fc1 -> fc2, all VMEM-resident.

    x_ref:  (tile_m, K0p) bf16, per-sample (Hpad, C, W)-order flatten of the
            ROI with the vertical conv zero-padding already materialized.
    conv1:  for each output row `ho`, one (tile_m, band_k) @ (band_k, C1*W1)
            matmul on the shared band matrix; pieces concatenated lane-wise
            into the (H1, C1, W1)-order feature vector.
    conv2:  folded dense bf16 matmul.  fc1/fc2: f32 weights, HIGHEST precision.
    """
    x = x_ref[...]                       # (tile_m, K0p) bf16
    wband = wband_ref[...]               # (band_k, C1*W1) bf16

    # --- conv1: banded matmuls, one per output row -------------------------
    pieces = []
    for ho in range(h1):                 # unrolled at trace time (h1 is small)
        start = ho * slab_stride         # multiple of C*W (lane-aligned here)
        slab = x[:, start:start + band_k]
        pieces.append(jnp.dot(slab, wband,
                              preferred_element_type=jnp.float32))
    h = jnp.concatenate(pieces, axis=-1) + b1_ref[...]
    h = jnp.maximum(h, 0.0)

    # --- conv2 (folded dense, bf16 MXU feed, f32 accumulate) ---------------
    h = jnp.dot(h.astype(jnp.bfloat16), wb_ref[...],
                preferred_element_type=jnp.float32) + bb_ref[...]
    h = jnp.maximum(h, 0.0)

    # --- fc1 / fc2: tiny matmuls kept in f32 for output parity -------------
    h = jnp.dot(h, wc_ref[...], precision=lax.Precision.HIGHEST,
                preferred_element_type=jnp.float32) + bc_ref[...]
    h = jnp.maximum(h, 0.0)
    h = jnp.dot(h, wd_ref[...], precision=lax.Precision.HIGHEST,
                preferred_element_type=jnp.float32) + bd_ref[...]

    o_ref[...] = h.astype(o_ref.dtype)


# ----------------------------------------------------------------------------
# Forward wrapper (ROI crop + flatten glue, then one pallas_call)
# ----------------------------------------------------------------------------
def roi_wrapper_forward(weights, x_nchw, *, num_outputs, block_m=128):
    """ROI crop + fused StaticSizeCNN forward.  x_nchw: [N, C, H, W] float32."""
    n, c_in, h_img, w_img = x_nchw.shape
    crop_h = int(h_img * ROI_CROP_RATIO)          # PyTorch: x[:, :, ch:, :]
    roi_h = h_img - crop_h

    # Static conv geometry (must match fold_params).
    h1 = (roi_h + 2 * CONV_PAD - CONV_K) // CONV_STRIDE + 1
    rows_needed = CONV_STRIDE * (h1 - 1) + CONV_K
    pad_top = CONV_PAD
    pad_bot = max(0, rows_needed - (roi_h + pad_top))

    # ROI crop + (H, C, W)-order flatten with the VERTICAL conv zero-padding
    # materialized as zero rows, so every conv1 band slab is in-range and the
    # same band matrix applies to all output rows.  bf16 cast happens here.
    x_roi = x_nchw[:, :, crop_h:, :]                       # [N, C, Hroi, W]
    x_hcw = jnp.transpose(x_roi, (0, 2, 1, 3))             # [N, Hroi, C, W]
    x_hcw = jnp.pad(x_hcw, ((0, 0), (pad_top, pad_bot), (0, 0), (0, 0)))
    x_flat = x_hcw.reshape(n, -1).astype(jnp.bfloat16)

    k0 = x_flat.shape[1]
    k0p = _round_up(k0, _LANE)
    tile_m = min(block_m, _round_up(max(n, _SUBLANE), _SUBLANE))
    m_pad = _round_up(max(n, tile_m), tile_m)
    x_flat = jnp.pad(x_flat, ((0, m_pad - n), (0, k0p - k0)))

    band_k = weights["w_band"].shape[0]                    # KH * C * W
    slab_stride = CONV_STRIDE * c_in * w_img
    out_lanes = weights["wd"].shape[1]
    assert band_k == CONV_K * c_in * w_img
    assert weights["wb"].shape[0] == h1 * weights["w_band"].shape[1]

    kernel = functools.partial(_fused_cnn_kernel, h1=h1,
                               slab_stride=slab_stride, band_k=band_k)

    grid = (m_pad // tile_m,)
    # Weights / biases use full-array blocks with a CONSTANT index_map: they
    # are DMA'd into VMEM once per call and stay resident while the grid walks
    # the batch-row tiles (amortizes weight bytes over the whole batch).
    out_padded = pl.pallas_call(
        kernel,
        out_shape=jax.ShapeDtypeStruct((m_pad, out_lanes), jnp.float32),
        grid=grid,
        in_specs=[
            pl.BlockSpec((tile_m, k0p), lambda i: (i, 0)),
            pl.BlockSpec(weights["w_band"].shape, lambda i: (0, 0)),
            pl.BlockSpec(weights["b1"].shape, lambda i: (0, 0)),
            pl.BlockSpec(weights["wb"].shape, lambda i: (0, 0)),
            pl.BlockSpec(weights["bb"].shape, lambda i: (0, 0)),
            pl.BlockSpec(weights["wc"].shape, lambda i: (0, 0)),
            pl.BlockSpec(weights["bc"].shape, lambda i: (0, 0)),
            pl.BlockSpec(weights["wd"].shape, lambda i: (0, 0)),
            pl.BlockSpec(weights["bd"].shape, lambda i: (0, 0)),
        ],
        out_specs=pl.BlockSpec((tile_m, out_lanes), lambda i: (i, 0)),
        compiler_params=pltpu.CompilerParams(
            dimension_semantics=("parallel",)),      # v7x: 2 TCs split rows
    )(x_flat, weights["w_band"], weights["b1"], weights["wb"], weights["bb"],
      weights["wc"], weights["bc"], weights["wd"], weights["bd"])

    return out_padded[:n, :num_outputs]


# ----------------------------------------------------------------------------
# Parameter preprocessing (runs once on host at load time)
# ----------------------------------------------------------------------------
def _conv1_band_matrix(w_oihw, c_in, h_in, w_in, *, stride, pad):
    """Shared row-band matrix for conv1.

    Maps a 3-input-row slab, flattened in (row, C, W) order, to one conv1
    output row flattened in (C_out, W_out) order.  Horizontal zero-padding is
    baked into the matrix; vertical padding is handled by physically padding
    the input rows in the wrapper.
    """
    w = np.asarray(w_oihw, np.float32)
    c_out, _, kh, kw = w.shape
    h_out = (h_in + 2 * pad - kh) // stride + 1
    w_out = (w_in + 2 * pad - kw) // stride + 1
    band = np.zeros((kh * c_in * w_in, c_out * w_out), np.float32)
    col_co = np.arange(c_out) * w_out
    for ki in range(kh):
        for c in range(c_in):
            for wo in range(w_out):
                for kj in range(kw):
                    wi = wo * stride + kj - pad
                    if 0 <= wi < w_in:
                        row = (ki * c_in + c) * w_in + wi
                        band[row, col_co + wo] += w[:, c, ki, kj]
    return band, h_out, w_out


def _fold_conv_to_dense(w_oihw, c_in, h_in, w_in, *, stride, pad,
                        input_layout="chw"):
    """Exact fold of a conv (PyTorch OIHW weights) into a per-sample matrix A
    with conv(x).reshape(-1) == x_flat @ A.  `input_layout` selects whether
    the input vector is flattened in (C,H,W) or (H,C,W) order; output columns
    are always (C,H,W) order (PyTorch .view(n,-1) convention)."""
    w = np.asarray(w_oihw, np.float32)
    c_out, _, kh, kw = w.shape
    h_out = (h_in + 2 * pad - kh) // stride + 1
    w_out = (w_in + 2 * pad - kw) // stride + 1
    a = np.zeros((c_in * h_in * w_in, c_out * h_out * w_out), np.float32)
    out_ch_off = np.arange(c_out) * (h_out * w_out)
    for ho in range(h_out):
        for wo in range(w_out):
            for ki in range(kh):
                hi = ho * stride + ki - pad
                if not 0 <= hi < h_in:
                    continue
                for kj in range(kw):
                    wi = wo * stride + kj - pad
                    if not 0 <= wi < w_in:
                        continue
                    if input_layout == "chw":
                        rows = np.arange(c_in) * (h_in * w_in) + hi * w_in + wi
                    else:  # "hcw"
                        rows = hi * (c_in * w_in) + np.arange(c_in) * w_in + wi
                    cols = out_ch_off + ho * w_out + wo
                    a[np.ix_(rows, cols)] += w[:, :, ki, kj].T
    return a, h_out, w_out


def _pack(mat, bias, rows_p, cols_p, w_dtype):
    wp = np.zeros((rows_p, cols_p), np.float32)
    wp[: mat.shape[0], : mat.shape[1]] = mat
    bp = np.zeros((1, cols_p), np.float32)
    bp[0, : bias.shape[0]] = bias
    return jnp.asarray(wp, w_dtype), jnp.asarray(bp, jnp.float32)


def fold_params(params, in_channels, roi_h, roi_w):
    conv1_w = np.asarray(params["conv1_w"], np.float32)
    conv2_w = np.asarray(params["conv2_w"], np.float32)
    c1 = conv1_w.shape[0]

    # conv1: keep only the non-zero row band (kh*C*W rows) instead of the
    # ~95%-sparse dense fold; one small matrix shared by every output row.
    band, h1, w1 = _conv1_band_matrix(conv1_w, in_channels, roi_h, roi_w,
                                      stride=CONV_STRIDE, pad=CONV_PAD)
    b1 = np.tile(np.repeat(np.asarray(params["conv1_b"], np.float32), w1), h1)

    # conv2: dense fold (small); input rows in (H1, C1, W1) order to match the
    # conv1 band output, output cols in PyTorch (C2, H2, W2) flatten order.
    a2, h2, w2 = _fold_conv_to_dense(conv2_w, c1, h1, w1,
                                     stride=CONV_STRIDE, pad=CONV_PAD,
                                     input_layout="hcw")
    assert a2.shape[0] == c1 * h1 * w1 and band.shape[1] == c1 * w1
    b2 = np.repeat(np.asarray(params["conv2_b"], np.float32), h2 * w2)

    fc1_w = np.asarray(params["fc1_w"], np.float32)    # (hidden, C2*H2*W2)
    fc1_b = np.asarray(params["fc1_b"], np.float32)
    fc2_w = np.asarray(params["fc2_w"], np.float32)    # (out, hidden)
    fc2_b = np.asarray(params["fc2_b"], np.float32)

    k2 = _round_up(a2.shape[1], _LANE)     # conv2 features (lane padded)
    k3 = _round_up(fc1_w.shape[0], _LANE)  # hidden
    k4 = _round_up(fc2_w.shape[0], _LANE)  # outputs (lane-dense final slab)

    wb, bb = _pack(a2, b2, a2.shape[0], k2, jnp.bfloat16)
    # fc1/fc2 kept in f32 (tiny matmuls; tightens the 2-logit head vs PyTorch).
    wc, bc = _pack(fc1_w.T, fc1_b, k2, k3, jnp.float32)
    wd, bd = _pack(fc2_w.T, fc2_b, k3, k4, jnp.float32)

    return {"w_band": jnp.asarray(band, jnp.bfloat16),
            "b1": jnp.asarray(b1[None, :], jnp.float32),
            "wb": wb, "bb": bb, "wc": wc, "bc": bc, "wd": wd, "bd": bd}


# ----------------------------------------------------------------------------
# Synthetic StaticSizeCNN parameters (PyTorch-native layouts) + JAX reference
# ----------------------------------------------------------------------------
def init_static_cnn_params(key, in_channels, roi_h, roi_w):
    """Synthetic StaticSizeCNN params in PyTorch layouts (conv: OIHW, linear:
    (out, in), flatten: (C,H,W) order) so real checkpoints could drop in."""
    k = jax.random.split(key, 8)
    c1, c2, hidden, out_dim = 8, 16, 32, 2

    def conv_out(size):
        return (size + 2 * CONV_PAD - CONV_K) // CONV_STRIDE + 1

    h1, w1 = conv_out(roi_h), conv_out(roi_w)
    h2, w2 = conv_out(h1), conv_out(w1)
    flat = c2 * h2 * w2
    return {
        "conv1_w": 0.1 * jax.random.normal(k[0], (c1, in_channels, 3, 3), jnp.float32),
        "conv1_b": 0.01 * jax.random.normal(k[1], (c1,), jnp.float32),
        "conv2_w": 0.1 * jax.random.normal(k[2], (c2, c1, 3, 3), jnp.float32),
        "conv2_b": 0.01 * jax.random.normal(k[3], (c2,), jnp.float32),
        "fc1_w": 0.1 * jax.random.normal(k[4], (hidden, flat), jnp.float32),
        "fc1_b": 0.01 * jax.random.normal(k[5], (hidden,), jnp.float32),
        "fc2_w": 0.1 * jax.random.normal(k[6], (out_dim, hidden), jnp.float32),
        "fc2_b": 0.01 * jax.random.normal(k[7], (out_dim,), jnp.float32),
    }


def reference_forward(params, x_nchw):
    """Pure-JAX/XLA reference (standard conv ops) for a correctness check."""
    crop_h = int(x_nchw.shape[2] * ROI_CROP_RATIO)
    x = x_nchw[:, :, crop_h:, :]

    def conv(x, w, b):
        y = lax.conv_general_dilated(
            x, w, window_strides=(CONV_STRIDE, CONV_STRIDE),
            padding=((CONV_PAD, CONV_PAD), (CONV_PAD, CONV_PAD)),
            dimension_numbers=("NCHW", "OIHW", "NCHW"))
        return jnp.maximum(y + b[None, :, None, None], 0.0)

    x = conv(x, params["conv1_w"], params["conv1_b"])
    x = conv(x, params["conv2_w"], params["conv2_b"])
    x = x.reshape(x.shape[0], -1)
    x = jnp.maximum(x @ params["fc1_w"].T + params["fc1_b"], 0.0)
    return x @ params["fc2_w"].T + params["fc2_b"]


if __name__ == "__main__":
    key = jax.random.PRNGKey(0)
    k_in, k_params = jax.random.split(key)

    # Small input consistent with the module: NCHW image batch.
    N, C, H, W = 2, 4, 16, 16
    x = jax.random.normal(k_in, (N, C, H, W), jnp.float32)

    crop_height = int(H * ROI_CROP_RATIO)          # = 4 -> ROI height = 12
    params = init_static_cnn_params(k_params, C, H - crop_height, W)
    weights = fold_params(params, C, H - crop_height, W)

    fwd = jax.jit(functools.partial(roi_wrapper_forward, num_outputs=2))
    out = jax.block_until_ready(fwd(weights, x))

    assert out.shape == (N, 2), out.shape
    assert bool(jnp.all(jnp.isfinite(out)))

    # Check against the pure-JAX conv reference (conv stages use bf16 on the
    # MXU -> moderate tolerance; fc1/fc2 run in f32/HIGHEST).
    ref = jax.block_until_ready(reference_forward(params, x))
    assert bool(jnp.allclose(out, ref, rtol=5e-2, atol=2e-2)), (out, ref)

    print("KERNEL_OK")
</pallas_src>

<mosaic_0001>
module attributes {stable_mosaic.version = 11 : i64} {
  func.func @_fused_cnn_kernel(%arg0: i32, %arg1: memref<8x896xbf16, #tpu.memory_space<vmem>>, %arg2: memref<192x64xbf16, #tpu.memory_space<vmem>>, %arg3: memref<1x384xf32, #tpu.memory_space<vmem>>, %arg4: memref<384x256xbf16, #tpu.memory_space<vmem>>, %arg5: memref<1x256xf32, #tpu.memory_space<vmem>>, %arg6: memref<256x128xf32, #tpu.memory_space<vmem>>, %arg7: memref<1x128xf32, #tpu.memory_space<vmem>>, %arg8: memref<128x128xf32, #tpu.memory_space<vmem>>, %arg9: memref<1x128xf32, #tpu.memory_space<vmem>>, %arg10: memref<8x128xf32, #tpu.memory_space<vmem>>) attributes {dimension_semantics = [#tpu.dimension_semantics<parallel>], iteration_bounds = array<i64: 1>, scalar_prefetch = 0 : i64, scratch_operands = 0 : i64, tpu.core_type = #tpu.core_type<tc>, window_params = [{transform_indices = @transform_0, window_bounds = array<i64: 8, 896>}, {pipeline_mode = #tpu.pipeline_mode<synchronous>, transform_indices = @transform_1, window_bounds = array<i64: 192, 64>}, {pipeline_mode = #tpu.pipeline_mode<synchronous>, transform_indices = @transform_2, window_bounds = array<i64: 1, 384>}, {pipeline_mode = #tpu.pipeline_mode<synchronous>, transform_indices = @transform_3, window_bounds = array<i64: 384, 256>}, {pipeline_mode = #tpu.pipeline_mode<synchronous>, transform_indices = @transform_4, window_bounds = array<i64: 1, 256>}, {pipeline_mode = #tpu.pipeline_mode<synchronous>, transform_indices = @transform_5, window_bounds = array<i64: 256, 128>}, {pipeline_mode = #tpu.pipeline_mode<synchronous>, transform_indices = @transform_6, window_bounds = array<i64: 1, 128>}, {pipeline_mode = #tpu.pipeline_mode<synchronous>, transform_indices = @transform_7, window_bounds = array<i64: 128, 128>}, {pipeline_mode = #tpu.pipeline_mode<synchronous>, transform_indices = @transform_8, window_bounds = array<i64: 1, 128>}, {transform_indices = @transform_9, window_bounds = array<i64: 8, 128>}]} {
    %c0 = arith.constant 0 : index
    %c0_0 = arith.constant 0 : index
    %0 = vector.load %arg1[%c0, %c0_0] : memref<8x896xbf16, #tpu.memory_space<vmem>>, vector<8x896xbf16>
    %c0_1 = arith.constant 0 : index
    %c0_2 = arith.constant 0 : index
    %1 = vector.load %arg2[%c0_1, %c0_2] : memref<192x64xbf16, #tpu.memory_space<vmem>>, vector<192x64xbf16>
    %2 = vector.extract_strided_slice %0 {offsets = [0, 0], sizes = [8, 192], strides = [1, 1]} : vector<8x896xbf16> to vector<8x192xbf16>
    %cst = arith.constant dense<0.000000e+00> : vector<8x64xf32>
    %3 = tpu.matmul %2, %1, %cst {dimension_numbers = #tpu.dot_dimension_numbers<[1], [0], [0], [1], [0, 0, 1, 1], [], []>} : vector<8x192xbf16>, vector<192x64xbf16>, vector<8x64xf32> -> vector<8x64xf32>
    %4 = vector.extract_strided_slice %0 {offsets = [0, 128], sizes = [8, 192], strides = [1, 1]} : vector<8x896xbf16> to vector<8x192xbf16>
    %cst_3 = arith.constant dense<0.000000e+00> : vector<8x64xf32>
    %5 = tpu.matmul %4, %1, %cst_3 {dimension_numbers = #tpu.dot_dimension_numbers<[1], [0], [0], [1], [0, 0, 1, 1], [], []>} : vector<8x192xbf16>, vector<192x64xbf16>, vector<8x64xf32> -> vector<8x64xf32>
    %6 = vector.extract_strided_slice %0 {offsets = [0, 256], sizes = [8, 192], strides = [1, 1]} : vector<8x896xbf16> to vector<8x192xbf16>
    %cst_4 = arith.constant dense<0.000000e+00> : vector<8x64xf32>
    %7 = tpu.matmul %6, %1, %cst_4 {dimension_numbers = #tpu.dot_dimension_numbers<[1], [0], [0], [1], [0, 0, 1, 1], [], []>} : vector<8x192xbf16>, vector<192x64xbf16>, vector<8x64xf32> -> vector<8x64xf32>
    %8 = vector.extract_strided_slice %0 {offsets = [0, 384], sizes = [8, 192], strides = [1, 1]} : vector<8x896xbf16> to vector<8x192xbf16>
    %cst_5 = arith.constant dense<0.000000e+00> : vector<8x64xf32>
    %9 = tpu.matmul %8, %1, %cst_5 {dimension_numbers = #tpu.dot_dimension_numbers<[1], [0], [0], [1], [0, 0, 1, 1], [], []>} : vector<8x192xbf16>, vector<192x64xbf16>, vector<8x64xf32> -> vector<8x64xf32>
    %10 = vector.extract_strided_slice %0 {offsets = [0, 512], sizes = [8, 192], strides = [1, 1]} : vector<8x896xbf16> to vector<8x192xbf16>
    %cst_6 = arith.constant dense<0.000000e+00> : vector<8x64xf32>
    %11 = tpu.matmul %10, %1, %cst_6 {dimension_numbers = #tpu.dot_dimension_numbers<[1], [0], [0], [1], [0, 0, 1, 1], [], []>} : vector<8x192xbf16>, vector<192x64xbf16>, vector<8x64xf32> -> vector<8x64xf32>
    %12 = vector.extract_strided_slice %0 {offsets = [0, 640], sizes = [8, 192], strides = [1, 1]} : vector<8x896xbf16> to vector<8x192xbf16>
    %cst_7 = arith.constant dense<0.000000e+00> : vector<8x64xf32>
    %13 = tpu.matmul %12, %1, %cst_7 {dimension_numbers = #tpu.dot_dimension_numbers<[1], [0], [0], [1], [0, 0, 1, 1], [], []>} : vector<8x192xbf16>, vector<192x64xbf16>, vector<8x64xf32> -> vector<8x64xf32>
    %14 = tpu.concatenate %3, %5, %7, %9, %11, %13 in 1 : vector<8x64xf32>, vector<8x64xf32>, vector<8x64xf32>, vector<8x64xf32>, vector<8x64xf32>, vector<8x64xf32> -> vector<8x384xf32>
    %c0_8 = arith.constant 0 : index
    %c0_9 = arith.constant 0 : index
    %15 = vector.load %arg3[%c0_8, %c0_9] : memref<1x384xf32, #tpu.memory_space<vmem>>, vector<1x384xf32>
    %16 = vector.broadcast %15 : vector<1x384xf32> to vector<8x384xf32>
    %17 = arith.addf %14, %16 : vector<8x384xf32>
    %cst_10 = arith.constant 0.000000e+00 : f32
    %18 = vector.broadcast %cst_10 : f32 to vector<8x384xf32>
    %19 = arith.maximumf %17, %18 : vector<8x384xf32>
    %20 = arith.truncf %19 : vector<8x384xf32> to vector<8x384xbf16>
    %c0_11 = arith.constant 0 : index
    %c0_12 = arith.constant 0 : index
    %21 = vector.load %arg4[%c0_11, %c0_12] : memref<384x256xbf16, #tpu.memory_space<vmem>>, vector<384x256xbf16>
    %cst_13 = arith.constant dense<0.000000e+00> : vector<8x256xf32>
    %22 = tpu.matmul %20, %21, %cst_13 {dimension_numbers = #tpu.dot_dimension_numbers<[1], [0], [0], [1], [0, 0, 1, 1], [], []>} : vector<8x384xbf16>, vector<384x256xbf16>, vector<8x256xf32> -> vector<8x256xf32>
    %c0_14 = arith.constant 0 : index
    %c0_15 = arith.constant 0 : index
    %23 = vector.load %arg5[%c0_14, %c0_15] : memref<1x256xf32, #tpu.memory_space<vmem>>, vector<1x256xf32>
    %24 = vector.broadcast %23 : vector<1x256xf32> to vector<8x256xf32>
    %25 = arith.addf %22, %24 : vector<8x256xf32>
    %cst_16 = arith.constant 0.000000e+00 : f32
    %26 = vector.broadcast %cst_16 : f32 to vector<8x256xf32>
    %27 = arith.maximumf %25, %26 : vector<8x256xf32>
    %c0_17 = arith.constant 0 : index
    %c0_18 = arith.constant 0 : index
    %28 = vector.load %arg6[%c0_17, %c0_18] : memref<256x128xf32, #tpu.memory_space<vmem>>, vector<256x128xf32>
    %cst_19 = arith.constant dense<0.000000e+00> : vector<8x128xf32>
    %29 = tpu.matmul %27, %28, %cst_19 {dimension_numbers = #tpu.dot_dimension_numbers<[1], [0], [0], [1], [0, 0, 1, 1], [], []>, precision = #tpu.contract_precision<fp32>} : vector<8x256xf32>, vector<256x128xf32>, vector<8x128xf32> -> vector<8x128xf32>
    %c0_20 = arith.constant 0 : index
    %c0_21 = arith.constant 0 : index
    %30 = vector.load %arg7[%c0_20, %c0_21] : memref<1x128xf32, #tpu.memory_space<vmem>>, vector<1x128xf32>
    %31 = vector.broadcast %30 : vector<1x128xf32> to vector<8x128xf32>
    %32 = arith.addf %29, %31 : vector<8x128xf32>
    %cst_22 = arith.constant 0.000000e+00 : f32
    %33 = vector.broadcast %cst_22 : f32 to vector<8x128xf32>
    %34 = arith.maximumf %32, %33 : vector<8x128xf32>
    %c0_23 = arith.constant 0 : index
    %c0_24 = arith.constant 0 : index
    %35 = vector.load %arg8[%c0_23, %c0_24] : memref<128x128xf32, #tpu.memory_space<vmem>>, vector<128x128xf32>
    %cst_25 = arith.constant dense<0.000000e+00> : vector<8x128xf32>
    %36 = tpu.matmul %34, %35, %cst_25 {dimension_numbers = #tpu.dot_dimension_numbers<[1], [0], [0], [1], [0, 0, 1, 1], [], []>, precision = #tpu.contract_precision<fp32>} : vector<8x128xf32>, vector<128x128xf32>, vector<8x128xf32> -> vector<8x128xf32>
    %c0_26 = arith.constant 0 : index
    %c0_27 = arith.constant 0 : index
    %37 = vector.load %arg9[%c0_26, %c0_27] : memref<1x128xf32, #tpu.memory_space<vmem>>, vector<1x128xf32>
    %38 = vector.broadcast %37 : vector<1x128xf32> to vector<8x128xf32>
    %39 = arith.addf %36, %38 : vector<8x128xf32>
    %c0_28 = arith.constant 0 : index
    %c0_29 = arith.constant 0 : index
    %40 = vector.load %arg10[%c0_28, %c0_29] : memref<8x128xf32, #tpu.memory_space<vmem>>, vector<8x128xf32>
    tpu.vector_store %arg10[%c0_28, %c0_29], %39 {strides = array<i32>} : memref<8x128xf32, #tpu.memory_space<vmem>>, vector<8x128xf32>,
    return
  }
  func.func @transform_0(%arg0: i32) -> (i32, i32) {
    %c0_i32 = arith.constant 0 : i32
    %c0_i32_0 = arith.constant 0 : i32
    return %arg0, %c0_i32 : i32, i32
  }
  func.func @transform_1(%arg0: i32) -> (i32, i32) {
    %c0_i32 = arith.constant 0 : i32
    %c0_i32_0 = arith.constant 0 : i32
    %c0_i32_1 = arith.constant 0 : i32
    return %c0_i32, %c0_i32_0 : i32, i32
  }
  func.func @transform_2(%arg0: i32) -> (i32, i32) {
    %c0_i32 = arith.constant 0 : i32
    %c0_i32_0 = arith.constant 0 : i32
    %c0_i32_1 = arith.constant 0 : i32
    return %c0_i32, %c0_i32_0 : i32, i32
  }
  func.func @transform_3(%arg0: i32) -> (i32, i32) {
    %c0_i32 = arith.constant 0 : i32
    %c0_i32_0 = arith.constant 0 : i32
    %c0_i32_1 = arith.constant 0 : i32
    return %c0_i32, %c0_i32_0 : i32, i32
  }
  func.func @transform_4(%arg0: i32) -> (i32, i32) {
    %c0_i32 = arith.constant 0 : i32
    %c0_i32_0 = arith.constant 0 : i32
    %c0_i32_1 = arith.constant 0 : i32
    return %c0_i32, %c0_i32_0 : i32, i32
  }
  func.func @transform_5(%arg0: i32) -> (i32, i32) {
    %c0_i32 = arith.constant 0 : i32
    %c0_i32_0 = arith.constant 0 : i32
    %c0_i32_1 = arith.constant 0 : i32
    return %c0_i32, %c0_i32_0 : i32, i32
  }
  func.func @transform_6(%arg0: i32) -> (i32, i32) {
    %c0_i32 = arith.constant 0 : i32
    %c0_i32_0 = arith.constant 0 : i32
    %c0_i32_1 = arith.constant 0 : i32
    return %c0_i32, %c0_i32_0 : i32, i32
  }
  func.func @transform_7(%arg0: i32) -> (i32, i32) {
    %c0_i32 = arith.constant 0 : i32
    %c0_i32_0 = arith.constant 0 : i32
    %c0_i32_1 = arith.constant 0 : i32
    return %c0_i32, %c0_i32_0 : i32, i32
  }
  func.func @transform_8(%arg0: i32) -> (i32, i32) {
    %c0_i32 = arith.constant 0 : i32
    %c0_i32_0 = arith.constant 0 : i32
    %c0_i32_1 = arith.constant 0 : i32
    return %c0_i32, %c0_i32_0 : i32, i32
  }
  func.func @transform_9(%arg0: i32) -> (i32, i32) {
    %c0_i32 = arith.constant 0 : i32
    %c0_i32_0 = arith.constant 0 : i32
    return %arg0, %c0_i32 : i32, i32
  }
}

</mosaic_0001>

<bundles_post_ra>
// kernel: roi_wrapper_forward.1
= control target key start
LH: loop header
LB: loop body
LE: loop exit
PB: predicated region body
PF: predicated region fallthrough
CT: control target
= control target key end

     0   :  { %14 = vsyncpa [#allocation3], 0  ;;  %s2178_s12 = smov [#allocation2]   ;;  %s2179_s14 = smov 128   ;;  %s3282_s0 = inlined_call_operand.vmem [shape: bf16[8,896], index: 0, kind: input, shape index: {}]   ;;  %s3283_s1 = inlined_call_operand.vmem [shape: bf16[192,64], index: 1, kind: input, shape index: {}]   ;;  %s3284_s2 = inlined_call_operand.vmem [shape: f32[1,384], index: 2, kind: input, shape index: {}]   ;;  %s3285_s3 = inlined_call_operand.hbm [shape: bf16[384,256], index: 3, kind: input, shape index: {}]   ;;  %s3286_s4 = inlined_call_operand.vmem [shape: f32[1,256], index: 4, kind: input, shape index: {}]   ;;  %s3287_s5 = inlined_call_operand.vmem [shape: f32[256,128], index: 5, kind: input, shape index: {}]   ;;  %s3288_s6 = inlined_call_operand.vmem [shape: f32[1,128], index: 6, kind: input, shape index: {}]   ;;  %s3289_s7 = inlined_call_operand.vmem [shape: f32[128,128], index: 7, kind: input, shape index: {}]   ;;  %s3290_s8 = inlined_call_operand.vmem [shape: f32[1,128], index: 8, kind: input, shape index: {}]   ;;  %s3291_s9 = inlined_call_operand.vmem [shape: f32[8,128], index: 9, kind: output, shape index: {}]  }
   0x1   :  { %s25_s11 = sshll.u32 %s3285_s3, 4  ;;  %s27_s13 = sshll.u32 %s2178_s12, 4  ;;  %s26_s11 = int_to_ptr.hbm [resolvable:$true] %s25_s11  ;;  %s28_s13 = int_to_ptr.vmem [resolvable:$true] %s27_s13 }
   0x2   :  { %s2180_s15 = smov 8  }
   0x3   :  { %33 = dma.hbm_to_vmem [thread:$0]  %s26_s11, 6144, %s28_s13, [#allocation3], %s2179_s14, %s2179_s14, %s2180_s15  }
   0x4   :  { %2176 = dma.done.wait [#allocation3], 6144  }
   0x5   :  { %2177 = vsyncadd [#allocation3], 4294961152  ;;  %v2238_v0 = vld [vmem:[%s3283_s1 + $0x38] sm:$0xff]  ;;  %v2245_v1 = vld [vmem:[%s3283_s1 + $0x30] sm:$0xff]  ;;  %vm155_vm0 = vcmask 523264  }
   0x6   :  { %159 = vmatpush.bf16.msra.mxu0 %v2238_v0  ;;  %192 = vmatpush.bf16.msra.mxu2 %v2238_v0  ;;  %v2250_v2 = vld [vmem:[%s3283_s1 + $0x58] sm:$0xff]  ;;  %v2256_v3 = vld [vmem:[%s3283_s1 + $0x50] sm:$0xff]  ;;  %v2264_v4 = vld [vmem:[%s3283_s1 + $0x28] sm:$0xff] }
   0x7   :  { %209 = vmatpush.bf16.msra.mxu3 %v2250_v2  ;;  %176 = vmatpush.bf16.msra.mxu1 %v2250_v2  ;;  %v2270_v5 = vld [vmem:[%s3283_s1 + $0x48] sm:$0xff]  ;;  %v2281_v7 = vld [vmem:[%s3283_s1 + $0x20] sm:$0xff]  ;;  %v2298_v12 = vld [vmem:[%s3283_s1 + $0x18] sm:$0xff] }
   0x8   :  { %v50_v6 = vld [vmem:[%s3282_s0 + $0x8] sm:$0xff]  ;;  %v49_v8 = vld [vmem:[%s3282_s0] sm:$0xff]  ;;  %v2309_v15 = vld [vmem:[%s3283_s1 + $0x10] sm:$0xff] }
   0x9   :  { %v186_v9 = vunpack.c.l.b16 %v50_v6  ;;  %v2290_v10 = vld [vmem:[%s3283_s1 + $0x40] sm:$0xff]  ;;  %v79_v11 = vunpack.c.h.b16 %v49_v8  ;;  %v2320_v16 = vld [vmem:[%s3283_s1 + $0x8] sm:$0xff]  ;;  %v78_v17 = vunpack.c.l.b16 %v49_v8  ;;  %v218_v20 = vunpack.c.h.b16 %v50_v6  ;;  %v51_v22 = vld [vmem:[%s3282_s0 + $0x10] sm:$0xff] }
   0xa   :  { %160 = vmatpush.bf16.msra.mxu0 %v2245_v1  ;;  %193 = vmatpush.bf16.msra.mxu2 %v2245_v1  ;;  %v2086_v18 = vld [vmem:[%s3283_s1] sm:$0xff]  ;;  %v251_v23 = vunpack.c.l.b16 %v51_v22  ;;  %v283_v25 = vunpack.c.h.b16 %v51_v22  ;;  %v52_v27 = vld [vmem:[%s3282_s0 + $0x18] sm:$0xf]  ;;  %v2016_v40 = vld [vmem:[#allocation2 + $0xf0] sm:$0xf]  ;;  %s2181_s0 = smov 64  }
   0xb   :  { %210 = vmatpush.bf16.msra.mxu3 %v2256_v3  ;;  %177 = vmatpush.bf16.msra.mxu1 %v2256_v3  ;;  %v187_v13 = vpack.c.b16 %v186_v9, %v186_v9  ;;  %v81_v14 = vpack.c.b16 %v79_v11, %v79_v11  ;;  %v80_v19 = vpack.c.b16 %v78_v17, %v78_v17  ;;  %v316_v28 = vunpack.c.l.b16 %v52_v27  ;;  %v2129_v41 = vld [vmem:[#allocation2 + $0xf4] sm:$0xf0]  ;;  %v2008_v42 = vld [vmem:[#allocation2 + $0xe0] sm:$0xf]  ;;  %v2127_v46 = vld [vmem:[#allocation2 + $0xe4] sm:$0xf0] }
   0xc   :  { %v219_v21 = vpack.c.b16 %v218_v20, %v218_v20  ;;  %v252_v24 = vpack.c.b16 %v251_v23, %v251_v23  ;;  %v284_v26 = vpack.c.b16 %v283_v25, %v283_v25  ;;  %v2017_v45 = vor.u32 %v2129_v41, %v2016_v40  ;;  %v1952_v47 = vld [vmem:[#allocation2 + $0x70] sm:$0xf]  ;;  %v2113_v48 = vld [vmem:[#allocation2 + $0x74] sm:$0xf0]  ;;  %v1944_v51 = vld [vmem:[#allocation2 + $0x60] sm:$0xf] }
   0xd   :  { %v317_v29 = vpack.c.b16 %v316_v28, %v316_v28  ;;  %v1953_v50 = vor.u32 %v2113_v48, %v1952_v47  ;;  %v2009_v52 = vor.u32 %v2127_v46, %v2008_v42  ;;  %v2111_v53 = vld [vmem:[#allocation2 + $0x64] sm:$0xf0]  ;;  %v2000_v54 = vld [vmem:[#allocation2 + $0xd0] sm:$0xf]  ;;  %v2125_v55 = vld [vmem:[#allocation2 + $0xd4] sm:$0xf0] }
   0xe   :  { %161 = vmatpush.bf16.msra.mxu0 %v2264_v4  ;;  %194 = vmatpush.bf16.msra.mxu2 %v2264_v4  ;;  %v1945_v56 = vor.u32 %v2111_v53, %v1944_v51  ;;  %v1936_v58 = vld [vmem:[#allocation2 + $0x50] sm:$0xf]  ;;  %v2109_v59 = vld [vmem:[#allocation2 + $0x54] sm:$0xf0]  ;;  %v2112_v62 = vld [vmem:[#allocation2 + $0x74] sm:$0xf] }
   0xf   :  { %211 = vmatpush.bf16.msra.mxu3 %v2270_v5  ;;  %178 = vmatpush.bf16.msra.mxu1 %v2270_v5  ;;  %v1954_v63 = vld [vmem:[#allocation2 + $0x78] sm:$0xf0]  ;;  %v1946_v6 = vld [vmem:[#allocation2 + $0x68] sm:$0xf0]  ;;  %v1928_v9 = vld [vmem:[#allocation2 + $0x40] sm:$0xf] }
  0x10   :  { %v2105_v22 = vld [vmem:[#allocation2 + $0x34] sm:$0xf0]  ;;  %v1930_v27 = vld [vmem:[#allocation2 + $0x48] sm:$0xf0]  ;;  %v2072_v28 = vld [vmem:[#allocation2 + $0x160] sm:$0xf] }
  0x11   :  { %v2117_v41 = vld [vmem:[#allocation2 + $0x94] sm:$0xf0]  ;;  %v1960_v48 = vld [vmem:[#allocation2 + $0x80] sm:$0xf] }
  0x12   :  { %162 = vmatpush.bf16.msra.mxu0 %v2281_v7  ;;  %195 = vmatpush.bf16.msra.mxu2 %v2281_v7 }
  0x13   :  { %212 = vmatpush.bf16.msra.mxu3 %v2290_v10  ;;  %179 = vmatpush.bf16.msra.mxu1 %v2290_v10 }
  0x16   :  { %163 = vmatpush.bf16.msra.mxu0 %v2298_v12  ;;  %196 = vmatpush.bf16.msra.mxu2 %v2298_v12 }
  0x17   :  { %241 = vmatpush.bf16.msrb.mxu3 %v2250_v2  ;;  %224 = vmatpush.bf16.msrb.mxu1 %v2238_v0 }
  0x18   :  { %1889 = vmatmul.msk.bf16.vlgmr.msra.gmra.mxu3 %vm155_vm0, %v187_v13  ;;  %1888 = vmatmul.msk.bf16.vlgmr.msra.gmra.mxu1 %vm155_vm0, %v81_v14 }
  0x1a   :  { %164 = vmatpush.bf16.msra.mxu0 %v2309_v15  ;;  %197 = vmatpush.bf16.msra.mxu2 %v2309_v15 }
  0x1b   :  { %242 = vmatpush.bf16.msrb.mxu3 %v2256_v3  ;;  %225 = vmatpush.bf16.msrb.mxu1 %v2245_v1 }
  0x1e   :  { %165 = vmatpush.bf16.msra.mxu0 %v2320_v16  ;;  %198 = vmatpush.bf16.msra.mxu2 %v2320_v16 }
  0x1f   :  { %243 = vmatpush.bf16.msrb.mxu3 %v2270_v5  ;;  %226 = vmatpush.bf16.msrb.mxu1 %v2264_v4 }
  0x22   :  { %166 = vmatpush.bf16.msra.mxu0 %v2086_v18  ;;  %199 = vmatpush.bf16.msra.mxu2 %v2086_v18 }
  0x23   :  { %244 = vmatpush.bf16.msrb.mxu3 %v2290_v10  ;;  %227 = vmatpush.bf16.msrb.mxu1 %v2281_v7 }
  0x25   :  { %200 = vmatmul.bf16.vlgmr.msra.gmra.mxu2 %v81_v14  ;;  %167 = vmatmul.bf16.vlgmr.msra.gmra.mxu0 %v80_v19  ;;  %v2145_v19 = vld [vmem:[#allocation2 + $0x174] sm:$0xf0] }
  0x26   :  { %257 = vmatpush.bf16.msrb.mxu0 %v2238_v0  ;;  %274 = vmatpush.bf16.msrb.mxu2 %v2250_v2 }
  0x27   :  { %289 = vmatpush.bf16.msra.mxu3 %v2238_v0  ;;  %228 = vmatpush.bf16.msrb.mxu1 %v2298_v12 }
  0x28   :  { %1890 = vmatmul.msk.bf16.vlgmr.msrb.gmra.mxu3 %vm155_vm0, %v219_v21 }
  0x2a   :  { %258 = vmatpush.bf16.msrb.mxu0 %v2245_v1  ;;  %275 = vmatpush.bf16.msrb.mxu2 %v2256_v3 }
  0x2b   :  { %290 = vmatpush.bf16.msra.mxu3 %v2245_v1  ;;  %229 = vmatpush.bf16.msrb.mxu1 %v2309_v15 }
  0x2e   :  { %259 = vmatpush.bf16.msrb.mxu0 %v2264_v4  ;;  %276 = vmatpush.bf16.msrb.mxu2 %v2270_v5 }
  0x2f   :  { %291 = vmatpush.bf16.msra.mxu3 %v2264_v4  ;;  %230 = vmatpush.bf16.msrb.mxu1 %v2320_v16 }
  0x32   :  { %260 = vmatpush.bf16.msrb.mxu0 %v2281_v7  ;;  %277 = vmatpush.bf16.msrb.mxu2 %v2290_v10 }
  0x33   :  { %292 = vmatpush.bf16.msra.mxu3 %v2281_v7  ;;  %231 = vmatpush.bf16.msrb.mxu1 %v2086_v18 }
  0x35   :  { %1891 = vmatmul.msk.bf16.vlgmr.msrb.gmra.mxu2 %vm155_vm0, %v252_v24 }
  0x36   :  { %322 = vmatpush.bf16.msra.mxu2 %v2238_v0  ;;  %261 = vmatpush.bf16.msrb.mxu0 %v2298_v12  ;;  %v2001_v0 = vor.u32 %v2125_v55, %v2000_v54  ;;  %v2082_v54 = vld [vmem:[#allocation2 + $0x178] sm:$0xf0]  ;;  %v1896_v55 = vld [vmem:[#allocation2] sm:$0xf] }
  0x37   :  { %306 = vmatpush.bf16.msra.mxu1 %v2250_v2  ;;  %293 = vmatpush.bf16.msra.mxu3 %v2298_v12 }
  0x38   :  { %232 = vmatmul.bf16.vlgmr.msrb.gmra.mxu1 %v187_v13  ;;  %v1938_v13 = vld [vmem:[#allocation2 + $0x58] sm:$0xf0] }
  0x3a   :  { %323 = vmatpush.bf16.msra.mxu2 %v2245_v1  ;;  %262 = vmatpush.bf16.msrb.mxu0 %v2309_v15  ;;  %v1992_v1 = vld [vmem:[#allocation2 + $0xc0] sm:$0xf] }
  0x3b   :  { %307 = vmatpush.bf16.msra.mxu1 %v2256_v3  ;;  %294 = vmatpush.bf16.msra.mxu3 %v2309_v15 }
  0x3e   :  { %324 = vmatpush.bf16.msra.mxu2 %v2264_v4  ;;  %263 = vmatpush.bf16.msrb.mxu0 %v2320_v16  ;;  %v1937_v4 = vor.u32 %v2109_v59, %v1936_v58 }
  0x3f   :  { %308 = vmatpush.bf16.msra.mxu1 %v2270_v5  ;;  %295 = vmatpush.bf16.msra.mxu3 %v2320_v16 }
  0x42   :  { %325 = vmatpush.bf16.msra.mxu2 %v2281_v7  ;;  %264 = vmatpush.bf16.msrb.mxu0 %v2086_v18 }
  0x43   :  { %309 = vmatpush.bf16.msra.mxu1 %v2290_v10  ;;  %296 = vmatpush.bf16.msra.mxu3 %v2086_v18 }
  0x45   :  { %265 = vmatmul.bf16.vlgmr.msrb.gmra.mxu0 %v219_v21  ;;  %v1920_v21 = vld [vmem:[#allocation2 + $0x30] sm:$0xf] }
  0x46   :  { %326 = vmatpush.bf16.msra.mxu2 %v2298_v12  ;;  %339 = vmatpush.bf16.msra.mxu0 %v2250_v2  ;;  %v1957_v2 = vor.u32 %v2112_v62, %v1954_v63  ;;  %v2108_v12 = vld [vmem:[#allocation2 + $0x54] sm:$0xf]  ;;  %v2074_v62 = vld [vmem:[#allocation2 + $0x168] sm:$0xf0] }
  0x47   :  { %297 = vmatmul.bf16.vlgmr.msra.gmra.mxu3 %v252_v24  ;;  %674 = vmatpush.bf16.msrb.mxu1 %v1953_v50  ;;  %v1941_v23 = vor.u32 %v2108_v12, %v1938_v13  ;;  %v2115_v50 = vld [vmem:[#allocation2 + $0x84] sm:$0xf0]  ;;  %v2102_v12 = vld [vmem:[#allocation2 + $0x24] sm:$0xf]  ;;  %v1914_v13 = vld [vmem:[#allocation2 + $0x28] sm:$0xf0] }
  0x48   :  { %1892 = vmatmul.msk.bf16.vlgmr.msra.gmra.mxu1 %vm155_vm0, %v284_v26  ;;  %687 = vmatpush.bf16.msrb.mxu3 %v2017_v45  ;;  %v2101_v45 = vld [vmem:[#allocation2 + $0x14] sm:$0xf0] }
  0x4a   :  { %327 = vmatpush.bf16.msra.mxu2 %v2309_v15  ;;  %340 = vmatpush.bf16.msra.mxu0 %v2256_v3  ;;  %v2123_v3 = vld [vmem:[#allocation2 + $0xc4] sm:$0xf0]  ;;  %v1984_v15 = vld [vmem:[#allocation2 + $0xb0] sm:$0xf] }
  0x4b   :  { %675 = vmatpush.bf16.msrb.mxu1 %v1945_v56  ;;  %v1993_v14 = vor.u32 %v2123_v3, %v1992_v1  ;;  %v2099_v56 = vld [vmem:[#allocation2 + $0x4] sm:$0xf0]  ;;  %v2104_v1 = vld [vmem:[#allocation2 + $0x34] sm:$0xf] }
  0x4c   :  { %688 = vmatpush.bf16.msrb.mxu3 %v2009_v52  ;;  %v2144_v52 = vld [vmem:[#allocation2 + $0x174] sm:$0xf]  ;;  %v1897_v59 = vor.u32 %v2099_v56, %v1896_v55 }
  0x4d   :  { %v2085_v58 = vor.u32 %v2144_v52, %v2082_v54  ;;  %v2128_v3 = vld [vmem:[#allocation2 + $0xf4] sm:$0xf] }
  0x4e   :  { %328 = vmatpush.bf16.msra.mxu2 %v2320_v16  ;;  %341 = vmatpush.bf16.msra.mxu0 %v2270_v5  ;;  %v2110_v5 = vld [vmem:[#allocation2 + $0x64] sm:$0xf]  ;;  %v2121_v16 = vld [vmem:[#allocation2 + $0xb4] sm:$0xf0]  ;;  %v2120_v52 = vld [vmem:[#allocation2 + $0xb4] sm:$0xf] }
  0x4f   :  { %v1949_v11 = vor.u32 %v2110_v5, %v1946_v6  ;;  %676 = vmatpush.bf16.msrb.mxu1 %v1937_v4  ;;  %v2018_v5 = vld [vmem:[#allocation2 + $0xf8] sm:$0xf0] }
  0x50   :  { %689 = vmatpush.bf16.msrb.mxu3 %v2001_v0  ;;  %v2021_v6 = vor.u32 %v2128_v3, %v2018_v5  ;;  %v2024_v3 = vld [vmem:[#allocation2 + $0x100] sm:$0xf]  ;;  %v2130_v5 = vld [vmem:[#allocation2 + $0x104] sm:$0xf] }
  0x52   :  { %329 = vmatpush.bf16.msra.mxu2 %v2086_v18  ;;  %342 = vmatpush.bf16.msra.mxu0 %v2290_v10  ;;  %v2107_v10 = vld [vmem:[#allocation2 + $0x44] sm:$0xf0]  ;;  %v2080_v18 = vld [vmem:[#allocation2 + $0x170] sm:$0xf] }
  0x53   :  { %v1929_v17 = vor.u32 %v2107_v10, %v1928_v9  ;;  %v2081_v24 = vor.u32 %v2145_v19, %v2080_v18  ;;  %v2140_v9 = vld [vmem:[#allocation2 + $0x154] sm:$0xf]  ;;  %v2056_v19 = vld [vmem:[#allocation2 + $0x140] sm:$0xf] }
  0x54   :  { %690 = vmatpush.bf16.msrb.mxu3 %v1993_v14 }
  0x55   :  { %330 = vmatmul.bf16.vlgmr.msra.gmra.mxu2 %v284_v26  ;;  %1893 = vmatmul.msk.bf16.vlgmr.msra.gmra.mxu0 %vm155_vm0, %v317_v29  ;;  %v2106_v26 = vld [vmem:[#allocation2 + $0x44] sm:$0xf]  ;;  %v1985_v29 = vor.u32 %v2121_v16, %v1984_v15  ;;  %v1917_v15 = vor.u32 %v2102_v12, %v1914_v13  ;;  %v1962_v13 = vld [vmem:[#allocation2 + $0x88] sm:$0xf0] }
  0x56   :  { %713 = vmatpush.bf16.msrb.mxu2 %v1957_v2  ;;  %700 = vmatpush.bf16.msrb.mxu0 %v2081_v24  ;;  %v1933_v40 = vor.u32 %v2106_v26, %v1930_v27  ;;  %v1922_v2 = vld [vmem:[#allocation2 + $0x38] sm:$0xf0]  ;;  %v2126_v16 = vld [vmem:[#allocation2 + $0xe4] sm:$0xf]  ;;  %v2100_v24 = vld [vmem:[#allocation2 + $0x14] sm:$0xf] }
  0x57   :  { %677 = vmatpush.bf16.msrb.mxu1 %v1929_v17  ;;  %v1925_v4 = vor.u32 %v2104_v1, %v1922_v2  ;;  %v2010_v17 = vld [vmem:[#allocation2 + $0xe8] sm:$0xf0]  ;;  %v2114_v12 = vld [vmem:[#allocation2 + $0x84] sm:$0xf] }
  0x58   :  { %691 = vmatpush.bf16.msrb.mxu3 %v1985_v29  ;;  %v2013_v18 = vor.u32 %v2126_v16, %v2010_v17  ;;  %v2002_v29 = vld [vmem:[#allocation2 + $0xd8] sm:$0xf0] }
  0x5a   :  { %714 = vmatpush.bf16.msrb.mxu2 %v1949_v11  ;;  %v2066_v11 = vld [vmem:[#allocation2 + $0x158] sm:$0xf0] }
  0x5b   :  { %v2069_v14 = vor.u32 %v2140_v9, %v2066_v11  ;;  %v1970_v9 = vld [vmem:[#allocation2 + $0x98] sm:$0xf0] }
  0x5e   :  { %715 = vmatpush.bf16.msrb.mxu2 %v1941_v23  ;;  %v2058_v23 = vld [vmem:[#allocation2 + $0x148] sm:$0xf0] }
  0x62   :  { %716 = vmatpush.bf16.msrb.mxu2 %v1933_v40  ;;  %v2050_v40 = vld [vmem:[#allocation2 + $0x138] sm:$0xf0] }
  0x66   :  { %717 = vmatpush.bf16.msrb.mxu2 %v1925_v4  ;;  %v2131_v4 = vld [vmem:[#allocation2 + $0x104] sm:$0xf0] }
  0x6a   :  { %718 = vmatpush.bf16.msrb.mxu2 %v1917_v15  ;;  %v1965_v15 = vor.u32 %v2114_v12, %v1962_v13  ;;  %v757_v13 = vld [vmem:[%s3287_s5 + $0x18] sm:$0xff] }
  0x95   :  { %v181_v30 = vpop.f32.mrf.mxu1 }
  0x9b   :  { %v2377_v31 = vpop.f32.mrf.mxu3 }
  0x9d   :  { %v183_v32 = vpop.f32.mrf.mxu1 }
  0x9e   :  { %v1976_v32 = vld [vmem:[#allocation2 + $0xa0] sm:$0xf] }
  0xa2   :  { %v168_v33 = vpop.f32.mrf.mxu0 }
  0xa3   :  { %v216_v34 = vpop.f32.mrf.mxu3  ;;  %v2379_v35 = vadd.f32 %v181_v30, %v168_v33  ;;  %v2143_v30 = vld [vmem:[#allocation2 + $0x164] sm:$0xf0] }
  0xa4   :  { %v2119_v33 = vld [vmem:[#allocation2 + $0xa4] sm:$0xf0]  ;;  %v1921_v34 = vor.u32 %v2105_v22, %v1920_v21  ;;  %v2138_v21 = vld [vmem:[#allocation2 + $0x144] sm:$0xf] }
  0xa5   :  { %v2061_v26 = vor.u32 %v2138_v21, %v2058_v23 }
  0xa6   :  { %678 = vmatpush.bf16.msrb.mxu1 %v1921_v34  ;;  %v2048_v34 = vld [vmem:[#allocation2 + $0x130] sm:$0xf] }
  0xa8   :  { %v2381_v36 = vpop.f32.mrf.mxu2 }
  0xa9   :  { %v215_v25 = vadd.f32 %v2377_v31, %v2381_v36  ;;  %v1977_v31 = vor.u32 %v2119_v33, %v1976_v32  ;;  %v1968_v36 = vld [vmem:[#allocation2 + $0x90] sm:$0xf] }
  0xaa   :  { %v170_v37 = vpop.f32.mrf.mxu0  ;;  %v1969_v46 = vor.u32 %v2117_v41, %v1968_v36  ;;  %v1898_v36 = vld [vmem:[#allocation2 + $0x8] sm:$0xf0] }
  0xab   :  { %v246_v44 = vpop.f32.mrf.mxu3  ;;  %v2073_v37 = vor.u32 %v2143_v30, %v2072_v28  ;;  %692 = vmatpush.bf16.msrb.mxu3 %v1977_v31  ;;  %v2124_v28 = vld [vmem:[#allocation2 + $0xd4] sm:$0xf]  ;;  %v2098_v31 = vld [vmem:[#allocation2 + $0x4] sm:$0xf] }
  0xac   :  { %v2005_v30 = vor.u32 %v2124_v28, %v2002_v29 }
  0xad   :  { %701 = vmatpush.bf16.msrb.mxu0 %v2073_v37  ;;  %v2137_v37 = vld [vmem:[#allocation2 + $0x134] sm:$0xf0] }
  0xaf   :  { %693 = vmatpush.bf16.msrb.mxu3 %v1969_v46  ;;  %v2040_v46 = vld [vmem:[#allocation2 + $0x120] sm:$0xf] }
  0xb0   :  { %v203_v38 = vpop.f32.mrf.mxu2 }
  0xb1   :  { %v1912_v38 = vld [vmem:[#allocation2 + $0x20] sm:$0xf] }
  0xb3   :  { %v248_v8 = vpop.f32.mrf.mxu3 }
  0xb4   :  { %v2141_v8 = vld [vmem:[#allocation2 + $0x154] sm:$0xf0] }
  0xb5   :  { %v233_v43 = vpop.f32.mrf.mxu1 }
  0xb6   :  { %v2383_v49 = vadd.f32 %v246_v44, %v233_v43  ;;  %v1904_v44 = vld [vmem:[#allocation2 + $0x10] sm:$0xf] }
  0xb7   :  { %v1905_v51 = vor.u32 %v2101_v45, %v1904_v44  ;;  %v1994_v44 = vld [vmem:[#allocation2 + $0xc8] sm:$0xf0] }
  0xb8   :  { %v279_v39 = vpop.f32.mrf.mxu2 }
  0xbd   :  { %v235_v7 = vpop.f32.mrf.mxu1 }
  0xbe   :  { %v2064_v7 = vld [vmem:[#allocation2 + $0x150] sm:$0xf] }
  0xbf   :  { %v2065_v10 = vor.u32 %v2141_v8, %v2064_v7  ;;  %v2026_v7 = vld [vmem:[#allocation2 + $0x108] sm:$0xf0]  ;;  %v2116_v8 = vld [vmem:[#allocation2 + $0x94] sm:$0xf] }
  0xc0   :  { %v281_v61 = vpop.f32.mrf.mxu2  ;;  %v1973_v11 = vor.u32 %v2116_v8, %v1970_v9 }
  0xc1   :  { %v2142_v61 = vld [vmem:[#allocation2 + $0x164] sm:$0xf]  ;;  %702 = vmatpush.bf16.msrb.mxu0 %v2065_v10  ;;  %v2029_v10 = vor.u32 %v2130_v5, %v2026_v7 }
  0xc2   :  { %v266_v57 = vpop.f32.mrf.mxu0  ;;  %v2077_v0 = vor.u32 %v2142_v61, %v2074_v62  ;;  %v2034_v62 = vld [vmem:[#allocation2 + $0x118] sm:$0xf0] }
  0xc3   :  { %v280_v60 = vadd.f32 %v279_v39, %v266_v57  ;;  %v2103_v39 = vld [vmem:[#allocation2 + $0x24] sm:$0xf0]  ;;  %v1961_v57 = vor.u32 %v2115_v50, %v1960_v48  ;;  %v2134_v48 = vld [vmem:[#allocation2 + $0x124] sm:$0xf] }
  0xc4   :  { %v1913_v42 = vor.u32 %v2103_v39, %v1912_v38  ;;  %v2136_v38 = vld [vmem:[#allocation2 + $0x134] sm:$0xf]  ;;  %v2049_v39 = vor.u32 %v2137_v37, %v2048_v34  ;;  %v763_v34 = vld [vmem:[%s3287_s5 + $0x48] sm:$0xff] }
  0xc5   :  { %353 = vrot.lane.b32.xlu0 %v280_v60, %s2181_s0  ;;  %694 = vmatpush.bf16.msrb.mxu3 %v1961_v57  ;;  %v2392_v33 = vpop.f32.mrf.mxu1  ;;  %v2053_v41 = vor.u32 %v2136_v38, %v2050_v40  ;;  %v2445_v40 = vand.u32 4294901760, %v763_v34 }
  0xc6   :  { %679 = vmatpush.bf16.msrb.mxu1 %v1913_v42  ;;  %v1901_v42 = vor.u32 %v2098_v31, %v1898_v36 }
  0xc9   :  { %739 = vmatpush.bf16.msra.mxu3 %v2085_v58  ;;  %v2032_v58 = vld [vmem:[#allocation2 + $0x110] sm:$0xf] }
  0xca   :  { %v268_v20 = vpop.f32.mrf.mxu0  ;;  %680 = vmatpush.bf16.msrb.mxu1 %v1905_v51  ;;  %v2390_v32 = vpop.f32.mrf.mxu3  ;;  %v2042_v51 = vld [vmem:[#allocation2 + $0x128] sm:$0xf0] }
  0xcb   :  { %v2139_v20 = vld [vmem:[#allocation2 + $0x144] sm:$0xf0]  ;;  %v2045_v54 = vor.u32 %v2134_v48, %v2042_v51 }
  0xcc   :  { %v2057_v22 = vor.u32 %v2139_v20, %v2056_v19  ;;  %v768_v19 = vld [vmem:[%s3287_s5 + $0x70] sm:$0xff]  ;;  %v767_v20 = vld [vmem:[%s3287_s5 + $0x68] sm:$0xff] }
  0xcd   :  { %349 = vrot.lane.b32.xlu0 %v215_v25, %s2181_s0  ;;  %740 = vmatpush.bf16.msra.mxu3 %v2077_v0  ;;  %v1906_v25 = vld [vmem:[#allocation2 + $0x18] sm:$0xf0]  ;;  %v313_v57 = vpop.f32.mrf.mxu1  ;;  %v1978_v0 = vld [vmem:[#allocation2 + $0xa8] sm:$0xf0]  ;;  %v2413_v23 = vand.u32 4294901760, %v768_v19 }
  0xce   :  { %681 = vmatpush.bf16.msrb.mxu1 %v1897_v59  ;;  %v1909_v27 = vor.u32 %v2100_v24, %v1906_v25  ;;  %703 = vmatpush.bf16.msrb.mxu0 %v2057_v22  ;;  %v2133_v59 = vld [vmem:[#allocation2 + $0x114] sm:$0xf0]  ;;  %v2415_v24 = vand.u32 4294901760, %v767_v20  ;;  %v766_v25 = vld [vmem:[%s3287_s5 + $0x60] sm:$0xff] }
  0xcf   :  { %v2033_v61 = vor.u32 %v2133_v59, %v2032_v58  ;;  %v2439_v38 = vsub.f32 %v768_v19, %v2413_v23 }
  0xd0   :  { %719 = vmatpush.bf16.msrb.mxu2 %v1909_v27  ;;  %v764_v27 = vld [vmem:[%s3287_s5 + $0x50] sm:$0xff] }
  0xd1   :  { %741 = vmatpush.bf16.msra.mxu3 %v2069_v14  ;;  %v2397_v14 = vld [vmem:[%s3284_s2] sm:$0x7] }
  0xd2   :  { %v344_v43 = vpop.f32.mrf.mxu0  ;;  %726 = vmatpush.bf16.msra.mxu1 %v2021_v6  ;;  %704 = vmatpush.bf16.msrb.mxu0 %v2049_v39  ;;  %v300_v56 = vpop.f32.mrf.mxu3  ;;  %v2025_v6 = vor.u32 %v2131_v4, %v2024_v3  ;;  %v366_v16 = vperm.slane %v2397_v14, 1  ;;  %v2442_v39 = vsub.f32 %v767_v20, %v2415_v24 }
  0xd4   :  { %720 = vmatpush.bf16.msrb.mxu2 %v1901_v42 }
  0xd5   :  { %742 = vmatpush.bf16.msra.mxu3 %v2061_v26  ;;  %v765_v26 = vld [vmem:[%s3287_s5 + $0x58] sm:$0xff] }
  0xd6   :  { %727 = vmatpush.bf16.msra.mxu1 %v2013_v18  ;;  %v769_v18 = vld [vmem:[%s3287_s5 + $0x78] sm:$0xff]  ;;  %v2428_v29 = vand.u32 4294901760, %v765_v26 }
  0xd7   :  { %v2411_v22 = vand.u32 4294901760, %v769_v18 }
  0xd8   :  { %v331_v47 = vpop.f32.mrf.mxu2 }
  0xd9   :  { %v345_v53 = vadd.f32 %v344_v43, %v331_v47  ;;  %v2122_v43 = vld [vmem:[#allocation2 + $0xc4] sm:$0xf]  ;;  %743 = vmatpush.bf16.msra.mxu3 %v2053_v41  ;;  %v2135_v47 = vld [vmem:[#allocation2 + $0x124] sm:$0xf0]  ;;  %v2436_v37 = vsub.f32 %v769_v18, %v2411_v22  ;;  %v2451_v41 = vsub.f32 %v765_v26, %v2428_v29  ;;  %v756_v26 = vld [vmem:[%s3287_s5 + $0x10] sm:$0xff] }
  0xda   :  { %v346_v60 = vpop.f32.mrf.mxu0  ;;  %728 = vmatpush.bf16.msra.mxu1 %v2005_v30  ;;  %v1997_v45 = vor.u32 %v2122_v43, %v1994_v44  ;;  %v2041_v50 = vor.u32 %v2135_v47, %v2040_v46  ;;  %v2430_v30 = vand.u32 4294901760, %v764_v27  ;;  %v365_v43 = vperm.slane %v2397_v14, 0  ;;  %v762_v47 = vld [vmem:[%s3287_s5 + $0x40] sm:$0xff] }
  0xdb   :  { %357 = vrot.lane.b32.xlu1 %v345_v53, %s2181_s0  ;;  %v1986_v53 = vld [vmem:[#allocation2 + $0xb8] sm:$0xf0]  ;;  %v2132_v60 = vld [vmem:[#allocation2 + $0x114] sm:$0xf]  ;;  %v833_v44 = vand.u32 4294901760, %v2436_v37  ;;  %v845_v46 = vand.u32 4294901760, %v2442_v39 }
  0xdc   :  { %v1989_v55 = vor.u32 %v2120_v52, %v1986_v53  ;;  %705 = vmatpush.bf16.msrb.mxu0 %v2041_v50  ;;  %v2037_v1 = vor.u32 %v2132_v60, %v2034_v62  ;;  %v2454_v42 = vsub.f32 %v764_v27, %v2430_v30  ;;  %v857_v51 = vand.u32 4294901760, %v2451_v41  ;;  %v761_v60 = vld [vmem:[%s3287_s5 + $0x38] sm:$0xff] }
  0xdd   :  { %744 = vmatpush.bf16.msra.mxu3 %v2045_v54  ;;  %v2469_v52 = vsub.f32 %v763_v34, %v2445_v40  ;;  %v834_v53 = vsub.f32 %v2436_v37, %v833_v44  ;;  %v2486_v59 = vand.u32 4294901760, %v762_v47  ;;  %v2512_v7 = vand.u32 4294901760, %v761_v60 }
  0xde   :  { %729 = vmatpush.bf16.msra.mxu1 %v1997_v45  ;;  %v839_v45 = vand.u32 4294901760, %v2439_v38  ;;  %v863_v58 = vand.u32 4294901760, %v2454_v42  ;;  %v858_v3 = vsub.f32 %v2451_v41, %v857_v51  ;;  %v312_v27 = vadd.f32 %v2392_v33, %v2390_v32  ;;  %v755_v33 = vld [vmem:[%s3287_s5 + $0x8] sm:$0xff] }
  0xdf   :  { %v869_v4 = vand.u32 4294901760, %v2469_v52 }
  0xe0   :  { %v333_v63 = vpop.f32.mrf.mxu2  ;;  %706 = vmatpush.bf16.msrb.mxu0 %v2033_v61  ;;  %v840_v54 = vsub.f32 %v2439_v38, %v839_v45  ;;  %v760_v61 = vld [vmem:[%s3287_s5 + $0x30] sm:$0xff]  ;;  %v859_v20 = vand.u32 4294901760, %v858_v3 }
  0xe1   :  { %v2118_v63 = vld [vmem:[#allocation2 + $0xa4] sm:$0xf]  ;;  %745 = vmatpush.bf16.msra.mxu3 %v2037_v1  ;;  %v759_v1 = vld [vmem:[%s3287_s5 + $0x28] sm:$0xff]  ;;  %v2514_v8 = vand.u32 4294901760, %v760_v61 }
  0xe2   :  { %730 = vmatpush.bf16.msra.mxu1 %v1989_v55  ;;  %v1981_v2 = vor.u32 %v2118_v63, %v1978_v0  ;;  %v846_v55 = vsub.f32 %v2442_v39, %v845_v46  ;;  %v835_v63 = vand.u32 4294901760, %v834_v53  ;;  %v841_v0 = vand.u32 4294901760, %v840_v54 }
  0xe3   :  { %v2520_v12 = vand.u32 4294901760, %v759_v1 }
  0xe4   :  { %707 = vmatpush.bf16.msrb.mxu0 %v2025_v6  ;;  %836 = vmatpush.msra.mxu2 %v835_v63  ;;  %v847_v5 = vand.u32 4294901760, %v846_v55  ;;  %v2510_v6 = vsub.f32 %v762_v47, %v2486_v59 }
  0xe5   :  { %746 = vmatpush.bf16.msra.mxu3 %v2029_v10 }
  0xe6   :  { %731 = vmatpush.bf16.msra.mxu1 %v1981_v2  ;;  %842 = vmatpush.msra.mxu2 %v841_v0  ;;  %v2584_v0 = vand.u32 4294901760, %v755_v33 }
  0xe8   :  { %791 = vmatpush.msra.mxu0 %v2411_v22  ;;  %848 = vmatpush.msra.mxu2 %v847_v5  ;;  %v784_v5 = vld [vmem:[%s3287_s5 + $0xf0] sm:$0xff] }
  0xea   :  { %732 = vmatpush.bf16.msra.mxu1 %v1973_v11  ;;  %793 = vmatpush.msra.mxu0 %v2413_v23  ;;  %v864_v11 = vsub.f32 %v2454_v42, %v863_v58 }
  0xec   :  { %795 = vmatpush.msra.mxu0 %v2415_v24 }
  0xee   :  { %733 = vmatpush.bf16.msra.mxu1 %v1965_v15  ;;  %v875_v15 = vand.u32 4294901760, %v2510_v6 }
  0xf0   :  { %v876_v47 = vsub.f32 %v2510_v6, %v875_v15 }
 0x137   :  { %v354_v17 = vpop.permute.xlu0 %353 }
 0x138   :  { %v361_v21 = vsel %vm155_vm0, %v2383_v49, %v354_v17  ;;  %v2426_v49 = vand.u32 4294901760, %v766_v25  ;;  %v2531_v17 = vsub.f32 %v760_v61, %v2514_v8 }
 0x139   :  { %v372_v28 = vadd.f32 %v366_v16, %v361_v21  ;;  %v2528_v16 = vsub.f32 %v761_v60, %v2512_v7  ;;  %v870_v21 = vsub.f32 %v2469_v52, %v869_v4  ;;  %v785_v60 = vld [vmem:[%s3287_s5 + $0xf8] sm:$0xff] }
 0x13a   :  { %v2448_v36 = vsub.f32 %v766_v25, %v2426_v49  ;;  %797 = vmatpush.msra.mxu0 %v2426_v49  ;;  %v2540_v25 = vand.u32 4294901760, %v757_v13  ;;  %v887_v53 = vand.u32 4294901760, %v2531_v17 }
 0x13b   :  { %v375_v31 = vmax.f32 %v372_v28, 0.0  ;;  %v367_v28 = vperm.slane %v2397_v14, 2  ;;  %v881_v34 = vand.u32 4294901760, %v2528_v16  ;;  %v2565_v14 = vand.u32 4294901760, %v756_v26 }
 0x13c   :  { %v851_v50 = vand.u32 4294901760, %v2448_v36  ;;  %799 = vmatpush.msra.mxu0 %v2428_v29  ;;  %v871_v55 = vand.u32 4294901760, %v870_v21  ;;  %v888_v3 = vsub.f32 %v2531_v17, %v887_v53 }
 0x13d   :  { %v2464_v48 = vpack.c.bf16 %v375_v31, %v375_v31  ;;  %v2550_v31 = vsub.f32 %v759_v1, %v2520_v12 }
 0x13e   :  { %v852_v57 = vsub.f32 %v2448_v36, %v851_v50  ;;  %801 = vmatpush.msra.mxu0 %v2430_v30 }
 0x13f   :  { %695 = vmatmul.bf16.vlgmr.msrb.gmra.mxu3 %v2464_v48  ;;  %v350_v56 = vpop.permute.xlu0 %349  ;;  %v893_v63 = vand.u32 4294901760, %v2550_v31 }
 0x140   :  { %v360_v62 = vsel %vm155_vm0, %v2379_v35, %v350_v56  ;;  %987 = vmatpush.msrb.mxu3 %v2411_v22  ;;  %v758_v35 = vld [vmem:[%s3287_s5 + $0x20] sm:$0xff]  ;;  %v853_v10 = vand.u32 4294901760, %v852_v57  ;;  %803 = vmatpush.msra.mxu0 %v2445_v40  ;;  %v2569_v56 = vsub.f32 %v757_v13, %v2540_v25 }
 0x141   :  { %v371_v2 = vadd.f32 %v365_v43, %v360_v62  ;;  %v2533_v18 = vand.u32 4294901760, %v758_v35  ;;  %v865_v43 = vand.u32 4294901760, %v864_v11  ;;  %v754_v57 = vld [vmem:[%s3287_s5] sm:$0xff]  ;;  %v882_v62 = vsub.f32 %v2528_v16, %v881_v34 }
 0x142   :  { %989 = vmatpush.msrb.mxu3 %v2413_v23  ;;  %854 = vmatpush.msra.mxu2 %v853_v10  ;;  %v2599_v10 = vand.u32 4294901760, %v754_v57  ;;  %v2601_v11 = vand.u32 4294901760, %v785_v60 }
 0x143   :  { %v374_v9 = vmax.f32 %v371_v2, 0.0  ;;  %v2558_v32 = vsub.f32 %v758_v35, %v2533_v18  ;;  %805 = vmatpush.msra.mxu0 %v2486_v59  ;;  %v877_v2 = vand.u32 4294901760, %v876_v47  ;;  %v883_v21 = vand.u32 4294901760, %v882_v62 }
 0x144   :  { %991 = vmatpush.msrb.mxu3 %v2415_v24  ;;  %860 = vmatpush.msra.mxu2 %v859_v20  ;;  %v783_v20 = vld [vmem:[%s3287_s5 + $0xe8] sm:$0xff]  ;;  %v889_v47 = vand.u32 4294901760, %v888_v3  ;;  %v2632_v62 = vsub.f32 %v785_v60, %v2601_v11 }
 0x145   :  { %v377_v19 = vpack.c.bf16 %v374_v9, %v374_v9  ;;  %v3292_v35 = vand.u32 4294901760, %v2558_v32  ;;  %807 = vmatpush.msra.mxu0 %v2512_v7  ;;  %v2597_v9 = vsub.f32 %v756_v26, %v2565_v14  ;;  %v894_v26 = vsub.f32 %v2550_v31, %v893_v63 }
 0x146   :  { %993 = vmatpush.msrb.mxu3 %v2426_v49  ;;  %866 = vmatpush.msra.mxu2 %v865_v43 }
 0x147   :  { %682 = vmatmul.bf16.vlgmr.msrb.gmra.mxu1 %v377_v19  ;;  %721 = vmatmul.bf16.vlgmr.msrb.gmra.mxu2 %v377_v19  ;;  %v3294_v19 = vand.u32 4294901760, %v2569_v56  ;;  %v895_v3 = vand.u32 4294901760, %v894_v26 }
 0x148   :  { %934 = vmatpush.msrb.mxu1 %v2436_v37  ;;  %995 = vmatpush.msrb.mxu3 %v2428_v29 }
 0x149   :  { %872 = vmatpush.msra.mxu2 %v871_v55  ;;  %809 = vmatpush.msra.mxu0 %v2514_v8  ;;  %v782_v55 = vld [vmem:[%s3287_s5 + $0xe0] sm:$0xff] }
 0x14a   :  { %937 = vmatpush.msrb.mxu1 %v2439_v38  ;;  %997 = vmatpush.msrb.mxu3 %v2430_v30  ;;  %v780_v38 = vld [vmem:[%s3287_s5 + $0xd0] sm:$0xff] }
 0x14b   :  { %878 = vmatpush.msra.mxu2 %v877_v2  ;;  %811 = vmatpush.msra.mxu0 %v2520_v12  ;;  %v906_v2 = vsub.f32 %v2569_v56, %v3294_v19 }
 0x14c   :  { %940 = vmatpush.msrb.mxu1 %v2442_v39  ;;  %999 = vmatpush.msrb.mxu3 %v2445_v40  ;;  %v2762_v39 = vand.u32 4294901760, %v780_v38 }
 0x14d   :  { %v358_v54 = vpop.permute.xlu1 %357  ;;  %884 = vmatpush.msra.mxu2 %v883_v21  ;;  %813 = vmatpush.msra.mxu0 %v2533_v18 }
 0x14e   :  { %v362_v61 = vsel %vm155_vm0, %v312_v27, %v358_v54  ;;  %943 = vmatpush.msrb.mxu1 %v2448_v36  ;;  %1001 = vmatpush.msrb.mxu3 %v2486_v59  ;;  %v2614_v27 = vsub.f32 %v755_v33, %v2584_v0  ;;  %v900_v54 = vsub.f32 %v2558_v32, %v3292_v35  ;;  %v3293_v33 = vand.u32 4294901760, %v2597_v9  ;;  %v779_v36 = vld [vmem:[%s3287_s5 + $0xc8] sm:$0xff] }
 0x14f   :  { %v373_v1 = vadd.f32 %v367_v28, %v362_v61  ;;  %v2616_v28 = vand.u32 4294901760, %v784_v5  ;;  %v2629_v61 = vsub.f32 %v754_v57, %v2599_v10  ;;  %v2644_v35 = vand.u32 4294901760, %v782_v55  ;;  %890 = vmatpush.msra.mxu2 %v889_v47  ;;  %815 = vmatpush.msra.mxu0 %v2540_v25 }
 0x150   :  { %946 = vmatpush.msrb.mxu1 %v2451_v41  ;;  %1003 = vmatpush.msrb.mxu3 %v2512_v7  ;;  %v901_v60 = vand.u32 4294901760, %v900_v54  ;;  %v912_v21 = vsub.f32 %v2597_v9, %v3293_v33  ;;  %v907_v54 = vand.u32 4294901760, %v906_v2 }
 0x151   :  { %v376_v13 = vmax.f32 %v373_v1, 0.0  ;;  %v2634_v1 = vand.u32 4294901760, %v783_v20  ;;  %v2642_v57 = vsub.f32 %v784_v5, %v2616_v28  ;;  %v3296_v26 = vand.u32 4294901760, %v2629_v61  ;;  %896 = vmatpush.msra.mxu2 %v895_v3  ;;  %817 = vmatpush.msra.mxu0 %v2565_v14 }
 0x152   :  { %949 = vmatpush.msrb.mxu1 %v2454_v42  ;;  %1005 = vmatpush.msrb.mxu3 %v2514_v8  ;;  %v2665_v19 = vsub.f32 %v782_v55, %v2644_v35  ;;  %v2772_v42 = vand.u32 4294901760, %v779_v36 }
 0x153   :  { %v379_v43 = vpack.c.bf16 %v376_v13, %v376_v13  ;;  %v917_v13 = vand.u32 4294901760, %v2614_v27  ;;  %v2655_v5 = vsub.f32 %v783_v20, %v2634_v1  ;;  %v1180_v33 = vand.u32 4294901760, %v2642_v57  ;;  %902 = vmatpush.msra.mxu2 %v901_v60  ;;  %819 = vmatpush.msra.mxu0 %v2584_v0 }
 0x154   :  { %952 = vmatpush.msrb.mxu1 %v2469_v52  ;;  %1007 = vmatpush.msrb.mxu3 %v2520_v12  ;;  %v913_v20 = vand.u32 4294901760, %v912_v21  ;;  %v1192_v21 = vand.u32 4294901760, %v2665_v19  ;;  %v2788_v52 = vsub.f32 %v779_v36, %v2772_v42 }
 0x155   :  { %708 = vmatmul.bf16.vlgmr.msrb.gmra.mxu0 %v379_v43  ;;  %747 = vmatmul.bf16.vlgmr.msra.gmra.mxu3 %v379_v43  ;;  %v3295_v43 = vand.u32 4294901760, %v2632_v62  ;;  %v918_v47 = vsub.f32 %v2614_v27, %v917_v13  ;;  %v1186_v3 = vand.u32 4294901760, %v2655_v5  ;;  %v1181_v60 = vsub.f32 %v2642_v57, %v1180_v33 }
 0x156   :  { %955 = vmatpush.msrb.mxu1 %v2510_v6  ;;  %1009 = vmatpush.msrb.mxu3 %v2533_v18  ;;  %v1210_v6 = vand.u32 4294901760, %v2788_v52 }
 0x157   :  { %734 = vmatmul.bf16.vlgmr.msra.gmra.mxu1 %v2464_v48  ;;  %v924_v48 = vsub.f32 %v2629_v61, %v3296_v26  ;;  %v1175_v2 = vsub.f32 %v2632_v62, %v3295_v43  ;;  %908 = vmatpush.msra.mxu2 %v907_v54  ;;  %v919_v55 = vand.u32 4294901760, %v918_v47  ;;  %v1187_v54 = vsub.f32 %v2655_v5, %v1186_v3 }
 0x158   :  { %958 = vmatpush.msrb.mxu1 %v2528_v16  ;;  %1011 = vmatpush.msrb.mxu3 %v2540_v25  ;;  %v1182_v47 = vand.u32 4294901760, %v1181_v60  ;;  %v1211_v16 = vsub.f32 %v2788_v52, %v1210_v6 }
 0x159   :  { %914 = vmatpush.msra.mxu2 %v913_v20  ;;  %v925_v43 = vand.u32 4294901760, %v924_v48  ;;  %v1176_v26 = vand.u32 4294901760, %v1175_v2  ;;  %821 = vmatpush.msra.mxu0 %v2599_v10  ;;  %v1193_v20 = vsub.f32 %v2665_v19, %v1192_v21  ;;  %v1188_v48 = vand.u32 4294901760, %v1187_v54  ;;  %v772_v54 = vld [vmem:[%s3287_s5 + $0x90] sm:$0xff] }
 0x15a   :  { %961 = vmatpush.msrb.mxu1 %v2531_v17  ;;  %1013 = vmatpush.msrb.mxu3 %v2565_v14 }
 0x15b   :  { %920 = vmatpush.msra.mxu2 %v919_v55  ;;  %1028 = vmatpush.msrb.mxu0 %v833_v44  ;;  %v1194_v37 = vand.u32 4294901760, %v1193_v20  ;;  %v2775_v44 = vsub.f32 %v780_v38, %v2762_v39 }
 0x15c   :  { %964 = vmatpush.msrb.mxu1 %v2550_v31  ;;  %1015 = vmatpush.msrb.mxu3 %v2584_v0  ;;  %v1212_v31 = vand.u32 4294901760, %v1211_v16 }
 0x15d   :  { %926 = vmatpush.msra.mxu2 %v925_v43  ;;  %1032 = vmatpush.msrb.mxu0 %v839_v45  ;;  %v778_v45 = vld [vmem:[%s3287_s5 + $0xc0] sm:$0xff] }
 0x15e   :  { %967 = vmatpush.msrb.mxu1 %v2558_v32  ;;  %1017 = vmatpush.msrb.mxu3 %v2599_v10 }
 0x15f   :  { %1095 = vmatpush.msrb.mxu2 %v2411_v22  ;;  %1036 = vmatpush.msrb.mxu0 %v845_v46  ;;  %v781_v22 = vld [vmem:[%s3287_s5 + $0xd8] sm:$0xff] }
 0x160   :  { %1177 = vmatpush.msra.mxu3 %v1176_v26  ;;  %970 = vmatpush.msrb.mxu1 %v2569_v56 }
 0x161   :  { %1097 = vmatpush.msrb.mxu2 %v2413_v23  ;;  %1040 = vmatpush.msrb.mxu0 %v851_v50  ;;  %v2729_v23 = vand.u32 4294901760, %v781_v22  ;;  %v1204_v50 = vand.u32 4294901760, %v2775_v44 }
 0x162   :  { %1183 = vmatpush.msra.mxu3 %v1182_v47  ;;  %973 = vmatpush.msrb.mxu1 %v2597_v9 }
 0x163   :  { %1099 = vmatpush.msrb.mxu2 %v2415_v24  ;;  %1044 = vmatpush.msrb.mxu0 %v857_v51  ;;  %v3301_v24 = vand.u32 4294901760, %v2558_v32  ;;  %v2785_v51 = vand.u32 4294901760, %v778_v45 }
 0x164   :  { %1189 = vmatpush.msra.mxu3 %v1188_v48  ;;  %976 = vmatpush.msrb.mxu1 %v2614_v27  ;;  %v2862_v48 = vand.u32 4294901760, %v772_v54 }
 0x165   :  { %1101 = vmatpush.msrb.mxu2 %v2426_v49  ;;  %1048 = vmatpush.msrb.mxu0 %v863_v58  ;;  %v3302_v49 = vand.u32 4294901760, %v2569_v56  ;;  %v777_v58 = vld [vmem:[%s3287_s5 + $0xb8] sm:$0xff] }
 0x166   :  { %1195 = vmatpush.msra.mxu3 %v1194_v37  ;;  %979 = vmatpush.msrb.mxu1 %v2629_v61  ;;  %v2876_v38 = vsub.f32 %v772_v54, %v2862_v48  ;;  %v428_v54 = vld [vmem:[%s3286_s4] sm:$0x3] }
 0x167   :  { %1103 = vmatpush.msrb.mxu2 %v2428_v29  ;;  %1052 = vmatpush.msrb.mxu0 %v869_v4  ;;  %v3303_v29 = vand.u32 4294901760, %v2597_v9  ;;  %v1205_v4 = vsub.f32 %v2775_v44, %v1204_v50 }
 0x168   :  { %1132 = vmatpush.msra.mxu1 %v2601_v11 }
 0x169   :  { %1105 = vmatpush.msrb.mxu2 %v2430_v30  ;;  %1056 = vmatpush.msrb.mxu0 %v875_v15  ;;  %v3304_v30 = vand.u32 4294901760, %v2629_v61  ;;  %v1206_v15 = vand.u32 4294901760, %v1205_v4 }
 0x16a   :  { %1134 = vmatpush.msra.mxu1 %v2616_v28 }
 0x16b   :  { %1107 = vmatpush.msrb.mxu2 %v2445_v40  ;;  %1060 = vmatpush.msrb.mxu0 %v881_v34  ;;  %v2765_v40 = vsub.f32 %v781_v22, %v2729_v23  ;;  %v775_v34 = vld [vmem:[%s3287_s5 + $0xa8] sm:$0xff] }
 0x16c   :  { %1136 = vmatpush.msra.mxu1 %v2634_v1 }
 0x16d   :  { %1109 = vmatpush.msrb.mxu2 %v2486_v59  ;;  %1064 = vmatpush.msrb.mxu0 %v887_v53  ;;  %v1198_v41 = vand.u32 4294901760, %v2765_v40  ;;  %v2820_v53 = vand.u32 4294901760, %v775_v34 }
 0x16e   :  { %1138 = vmatpush.msra.mxu1 %v2644_v35 }
 0x16f   :  { %1111 = vmatpush.msrb.mxu2 %v2512_v7  ;;  %1068 = vmatpush.msrb.mxu0 %v893_v63  ;;  %v1199_v46 = vsub.f32 %v2765_v40, %v1198_v41  ;;  %v2798_v7 = vand.u32 4294901760, %v777_v58  ;;  %v774_v63 = vld [vmem:[%s3287_s5 + $0xa0] sm:$0xff] }
 0x170   :  { %1140 = vmatpush.msra.mxu1 %v2729_v23  ;;  %v2834_v9 = vand.u32 4294901760, %v774_v63 }
 0x171   :  { %1113 = vmatpush.msrb.mxu2 %v2514_v8  ;;  %1072 = vmatpush.msrb.mxu0 %v3301_v24  ;;  %v1200_v59 = vand.u32 4294901760, %v1199_v46  ;;  %v2801_v8 = vsub.f32 %v778_v45, %v2785_v51  ;;  %v771_v24 = vld [vmem:[%s3287_s5 + $0x88] sm:$0xff]  ;;  %v3299_v46 = vand.u32 4294901760, %v2876_v38 }
 0x172   :  { %1142 = vmatpush.msra.mxu1 %v2762_v39  ;;  %v2853_v60 = vsub.f32 %v774_v63, %v2834_v9 }
 0x173   :  { %1115 = vmatpush.msrb.mxu2 %v2520_v12  ;;  %1076 = vmatpush.msrb.mxu0 %v3302_v49  ;;  %v776_v12 = vld [vmem:[%s3287_s5 + $0xb0] sm:$0xff]  ;;  %v1253_v16 = vsub.f32 %v2876_v38, %v3299_v46 }
 0x174   :  { %1144 = vmatpush.msra.mxu1 %v2772_v42  ;;  %1201 = vmatpush.msra.mxu3 %v1200_v59  ;;  %v2810_v17 = vand.u32 4294901760, %v776_v12  ;;  %v1240_v22 = vand.u32 4294901760, %v2853_v60 }
 0x175   :  { %1117 = vmatpush.msrb.mxu2 %v2533_v18  ;;  %1080 = vmatpush.msrb.mxu0 %v3303_v29  ;;  %v1216_v18 = vand.u32 4294901760, %v2801_v8 }
 0x176   :  { %1146 = vmatpush.msra.mxu1 %v2785_v51  ;;  %1207 = vmatpush.msra.mxu3 %v1206_v15  ;;  %v2823_v32 = vsub.f32 %v776_v12, %v2810_v17  ;;  %v1241_v36 = vsub.f32 %v2853_v60, %v1240_v22 }
 0x177   :  { %1119 = vmatpush.msrb.mxu2 %v2540_v25  ;;  %1084 = vmatpush.msrb.mxu0 %v917_v13  ;;  %v2814_v25 = vsub.f32 %v777_v58, %v2798_v7  ;;  %v773_v13 = vld [vmem:[%s3287_s5 + $0x98] sm:$0xff]  ;;  %v770_v58 = vld [vmem:[%s3287_s5 + $0x80] sm:$0xff] }
 0x178   :  { %1148 = vmatpush.msra.mxu1 %v2798_v7  ;;  %1213 = vmatpush.msra.mxu3 %v1212_v31  ;;  %v2850_v2 = vand.u32 4294901760, %v773_v13  ;;  %v1242_v59 = vand.u32 4294901760, %v1241_v36  ;;  %v2889_v4 = vand.u32 4294901760, %v770_v58 }
 0x179   :  { %1121 = vmatpush.msrb.mxu2 %v2565_v14  ;;  %1088 = vmatpush.msrb.mxu0 %v3304_v30  ;;  %v1217_v14 = vsub.f32 %v2801_v8, %v1216_v18  ;;  %v1222_v56 = vand.u32 4294901760, %v2814_v25  ;;  %v2873_v30 = vand.u32 4294901760, %v771_v24 }
 0x17a   :  { %1150 = vmatpush.msra.mxu1 %v2810_v17  ;;  %v2865_v37 = vsub.f32 %v773_v13, %v2850_v2  ;;  %v2900_v31 = vsub.f32 %v770_v58, %v2889_v4 }
 0x17b   :  { %1123 = vmatpush.msrb.mxu2 %v2584_v0  ;;  %v1228_v0 = vand.u32 4294901760, %v2823_v32  ;;  %v1218_v27 = vand.u32 4294901760, %v1217_v14  ;;  %v1223_v61 = vsub.f32 %v2814_v25, %v1222_v56  ;;  %v2892_v12 = vsub.f32 %v771_v24, %v2873_v30 }
 0x17c   :  { %1152 = vmatpush.msra.mxu1 %v2820_v53  ;;  %v3300_v29 = vand.u32 4294901760, %v2865_v37  ;;  %v1254_v14 = vand.u32 4294901760, %v1253_v16 }
 0x17d   :  { %1125 = vmatpush.msrb.mxu2 %v2599_v10  ;;  %v2837_v10 = vsub.f32 %v775_v34, %v2820_v53  ;;  %v1229_v26 = vsub.f32 %v2823_v32, %v1228_v0  ;;  %1219 = vmatpush.msra.mxu3 %v1218_v27  ;;  %v1224_v55 = vand.u32 4294901760, %v1223_v61  ;;  %v3298_v34 = vand.u32 4294901760, %v2892_v12 }
 0x17e   :  { %1154 = vmatpush.msra.mxu1 %v2834_v9  ;;  %v1247_v45 = vsub.f32 %v2865_v37, %v3300_v29  ;;  %v3297_v27 = vand.u32 4294901760, %v2900_v31 }
 0x17f   :  { %v1234_v43 = vand.u32 4294901760, %v2837_v10  ;;  %v1230_v47 = vand.u32 4294901760, %v1229_v26  ;;  %1225 = vmatpush.msra.mxu3 %v1224_v55  ;;  %v1259_v63 = vsub.f32 %v2892_v12, %v3298_v34 }
 0x180   :  { %1156 = vmatpush.msra.mxu1 %v2850_v2  ;;  %v1248_v15 = vand.u32 4294901760, %v1247_v45  ;;  %v1265_v13 = vsub.f32 %v2900_v31, %v3297_v27 }
 0x181   :  { %v1235_v20 = vsub.f32 %v2837_v10, %v1234_v43  ;;  %1231 = vmatpush.msra.mxu3 %v1230_v47  ;;  %v1260_v61 = vand.u32 4294901760, %v1259_v63 }
 0x182   :  { %1158 = vmatpush.msra.mxu1 %v2862_v48  ;;  %v1266_v26 = vand.u32 4294901760, %v1265_v13 }
 0x183   :  { %v1236_v49 = vand.u32 4294901760, %v1235_v20  ;;  %v430_v20 = vperm.slane %v428_v54, 0 }
 0x184   :  { %1160 = vmatpush.msra.mxu1 %v2873_v30 }
 0x185   :  { %1237 = vmatpush.msra.mxu3 %v1236_v49 }
 0x186   :  { %1162 = vmatpush.msra.mxu1 %v2889_v4 }
 0x187   :  { %1243 = vmatpush.msra.mxu3 %v1242_v59  ;;  %v431_v59 = vperm.slane %v428_v54, 1 }
 0x189   :  { %1249 = vmatpush.msra.mxu3 %v1248_v15 }
 0x18b   :  { %1255 = vmatpush.msra.mxu3 %v1254_v14 }
 0x18d   :  { %1261 = vmatpush.msra.mxu3 %v1260_v61 }
 0x18f   :  { %1267 = vmatpush.msra.mxu3 %v1266_v26 }
 0x1c2   :  { %v696_v55 = vpop.f32.mrf.mxu3 }
 0x1c4   :  { %v683_v47 = vpop.f32.mrf.mxu1 }
 0x1c5   :  { %v684_v24 = vadd.f32 %v683_v47, %v430_v20 }
 0x1c7   :  { %v697_v58 = vadd.f32 %v696_v55, %v684_v24  ;;  %v3305_v55 = vand.u32 4294901760, %v2632_v62 }
 0x1ca   :  { %v698_v49 = vpop.f32.mrf.mxu3  ;;  %v722_v36 = vpop.f32.mrf.mxu2 }
 0x1cb   :  { %v723_v61 = vadd.f32 %v722_v36, %v431_v59 }
 0x1cc   :  { %v685_v45 = vpop.f32.mrf.mxu1 }
 0x1d2   :  { %v709_v15 = vpop.f32.mrf.mxu0  ;;  %v724_v63 = vpop.f32.mrf.mxu2 }
 0x1d3   :  { %v710_v16 = vadd.f32 %v709_v15, %v697_v58  ;;  %v1480_v58 = vld [vmem:[%s3289_s7 + $0x38] sm:$0xff] }
 0x1d4   :  { %v735_v26 = vpop.f32.mrf.mxu1 }
 0x1d5   :  { %v752_v14 = vmax.f32 %v710_v16, 0.0  ;;  %v736_v27 = vadd.f32 %v735_v26, %v723_v61  ;;  %v1479_v61 = vld [vmem:[%s3289_s7 + $0x30] sm:$0xff] }
 0x1d7   :  { %v822_v13 = vand.u32 4294901760, %v752_v14 }
 0x1d8   :  { %v748_v34 = vpop.f32.mrf.mxu3 }
 0x1d9   :  { %v823_v46 = vsub.f32 %v752_v14, %v822_v13  ;;  %928 = vmatmul.f32.vlgmr.msra.gmra.mxu2 %v822_v13  ;;  %v749_v29 = vadd.f32 %v748_v34, %v736_v27  ;;  %v3118_v14 = vand.u32 4294901760, %v1480_v58 }
 0x1da   :  { %1328 = vmatpush.msra.mxu2 %v2601_v11  ;;  %v711_v47 = vpop.f32.mrf.mxu0 }
 0x1db   :  { %v824_v20 = vand.u32 4294901760, %v823_v46  ;;  %982 = vmatmul.f32.vlgmr.msrb.gmra.mxu1 %v823_v46  ;;  %v753_v49 = vmax.f32 %v749_v29, 0.0  ;;  %v3128_v47 = vsub.f32 %v1480_v58, %v3118_v14 }
 0x1dc   :  { %1330 = vmatpush.msra.mxu2 %v2616_v28  ;;  %1369 = vmatpush.msrb.mxu1 %v3305_v55  ;;  %v737_v34 = vpop.f32.mrf.mxu1  ;;  %v1478_v55 = vld [vmem:[%s3289_s7 + $0x28] sm:$0xff] }
 0x1dd   :  { %v825_v54 = vsub.f32 %v823_v46, %v824_v20  ;;  %1021 = vmatmul.f32.vlgmr.msrb.gmra.mxu3 %v824_v20  ;;  %v2916_v24 = vand.u32 4294901760, %v753_v49  ;;  %v3130_v20 = vand.u32 4294901760, %v1479_v61 }
 0x1de   :  { %1332 = vmatpush.msra.mxu2 %v2634_v1  ;;  %1373 = vmatpush.msrb.mxu1 %v1180_v33  ;;  %v1488_v33 = vld [vmem:[%s3289_s7 + $0x78] sm:$0xff] }
 0x1df   :  { %1436 = vmatpush.msrb.mxu3 %v2601_v11  ;;  %v826_v27 = vand.u32 4294901760, %v825_v54  ;;  %v2923_v29 = vsub.f32 %v753_v49, %v2916_v24  ;;  %v3146_v34 = vsub.f32 %v1479_v61, %v3130_v20 }
 0x1e0   :  { %1334 = vmatpush.msra.mxu2 %v2644_v35  ;;  %1377 = vmatpush.msrb.mxu1 %v1186_v3  ;;  %v750_v46 = vpop.f32.mrf.mxu3 }
 0x1e1   :  { %1438 = vmatpush.msrb.mxu3 %v2616_v28  ;;  %827 = vmatmul.f32.vlgmr.msra.gmra.mxu0 %v826_v27  ;;  %v1165_v36 = vand.u32 4294901760, %v2923_v29  ;;  %v3148_v27 = vand.u32 4294901760, %v1478_v55  ;;  %v1477_v46 = vld [vmem:[%s3289_s7 + $0x20] sm:$0xff] }
 0x1e2   :  { %1127 = vmatmul.f32.vlgmr.msrb.gmra.mxu2 %v822_v13  ;;  %1275 = vmatpush.msra.mxu0 %v2632_v62  ;;  %v2960_v62 = vand.u32 4294901760, %v1488_v33 }
 0x1e3   :  { %1336 = vmatpush.msra.mxu2 %v2729_v23  ;;  %1381 = vmatpush.msrb.mxu1 %v1192_v21  ;;  %v1166_v11 = vsub.f32 %v2923_v29, %v1165_v36  ;;  %v3306_v21 = vand.u32 4294901760, %v2865_v37 }
 0x1e4   :  { %1440 = vmatpush.msrb.mxu3 %v2634_v1  ;;  %1278 = vmatpush.msra.mxu0 %v2642_v57  ;;  %v2975_v1 = vsub.f32 %v1488_v33, %v2960_v62  ;;  %v3161_v33 = vsub.f32 %v1478_v55, %v3148_v27 }
 0x1e5   :  { %1338 = vmatpush.msra.mxu2 %v2762_v39  ;;  %1385 = vmatpush.msrb.mxu1 %v1198_v41  ;;  %v1167_v28 = vand.u32 4294901760, %v1166_v11  ;;  %v3308_v41 = vand.u32 4294901760, %v2892_v12 }
 0x1e6   :  { %1442 = vmatpush.msrb.mxu3 %v2644_v35  ;;  %1281 = vmatpush.msra.mxu0 %v2655_v5  ;;  %v1487_v35 = vld [vmem:[%s3289_s7 + $0x70] sm:$0xff]  ;;  %v1536_v5 = vand.u32 4294901760, %v2975_v1 }
 0x1e7   :  { %1269 = vmatmul.f32.vlgmr.msra.gmra.mxu3 %v2916_v24  ;;  %1340 = vmatpush.msra.mxu2 %v2772_v42 }
 0x1e8   :  { %1389 = vmatpush.msrb.mxu1 %v1204_v50  ;;  %1444 = vmatpush.msrb.mxu3 %v2729_v23  ;;  %v1537_v23 = vsub.f32 %v2975_v1, %v1536_v5 }
 0x1e9   :  { %1284 = vmatpush.msra.mxu0 %v2665_v19  ;;  %1342 = vmatpush.msra.mxu2 %v2785_v51  ;;  %v2967_v19 = vand.u32 4294901760, %v1487_v35 }
 0x1ea   :  { %1393 = vmatpush.msrb.mxu1 %v1210_v6  ;;  %1446 = vmatpush.msrb.mxu3 %v2762_v39  ;;  %v3307_v39 = vand.u32 4294901760, %v2876_v38  ;;  %v1485_v6 = vld [vmem:[%s3289_s7 + $0x60] sm:$0xff] }
 0x1eb   :  { %1168 = vmatmul.f32.vlgmr.msra.gmra.mxu1 %v1167_v28  ;;  %1090 = vmatmul.f32.vlgmr.msrb.gmra.mxu0 %v822_v13  ;;  %v2983_v57 = vsub.f32 %v1487_v35, %v2967_v19  ;;  %v1590_v28 = vand.u32 4294901760, %v3146_v34  ;;  %v3164_v35 = vand.u32 4294901760, %v1477_v46 }
 0x1ec   :  { %1287 = vmatpush.msra.mxu0 %v2765_v40  ;;  %1344 = vmatpush.msra.mxu2 %v2798_v7 }
 0x1ed   :  { %1397 = vmatpush.msrb.mxu1 %v1216_v18  ;;  %1448 = vmatpush.msrb.mxu3 %v2772_v42  ;;  %v1542_v3 = vand.u32 4294901760, %v2983_v57  ;;  %v1538_v42 = vand.u32 4294901760, %v1537_v23 }
 0x1ee   :  { %1290 = vmatpush.msra.mxu0 %v2775_v44  ;;  %1346 = vmatpush.msra.mxu2 %v2810_v17  ;;  %v3309_v44 = vand.u32 4294901760, %v2900_v31 }
 0x1ef   :  { %1401 = vmatpush.msrb.mxu1 %v1222_v56  ;;  %1450 = vmatpush.msrb.mxu3 %v2785_v51  ;;  %v1543_v40 = vsub.f32 %v2983_v57, %v1542_v3  ;;  %v1486_v51 = vld [vmem:[%s3289_s7 + $0x68] sm:$0xff] }
 0x1f0   :  { %1293 = vmatpush.msra.mxu0 %v2788_v52  ;;  %1348 = vmatpush.msra.mxu2 %v2820_v53  ;;  %v3040_v52 = vand.u32 4294901760, %v1486_v51 }
 0x1f1   :  { %1405 = vmatpush.msrb.mxu1 %v1228_v0  ;;  %1452 = vmatpush.msrb.mxu3 %v2798_v7  ;;  %v1544_v50 = vand.u32 4294901760, %v1543_v40  ;;  %v1596_v40 = vand.u32 4294901760, %v3161_v33 }
 0x1f2   :  { %1296 = vmatpush.msra.mxu0 %v2801_v8  ;;  %1350 = vmatpush.msra.mxu2 %v2834_v9  ;;  %v3046_v7 = vsub.f32 %v1486_v51, %v3040_v52  ;;  %v3048_v8 = vand.u32 4294901760, %v1485_v6 }
 0x1f3   :  { %1409 = vmatpush.msrb.mxu1 %v1234_v43  ;;  %1454 = vmatpush.msrb.mxu3 %v2810_v17  ;;  %v1484_v17 = vld [vmem:[%s3289_s7 + $0x58] sm:$0xff]  ;;  %v1482_v43 = vld [vmem:[%s3289_s7 + $0x48] sm:$0xff]  ;;  %v1597_v51 = vsub.f32 %v3161_v33, %v1596_v40 }
 0x1f4   :  { %1299 = vmatpush.msra.mxu0 %v2814_v25  ;;  %1352 = vmatpush.msra.mxu2 %v2850_v2  ;;  %v1548_v18 = vand.u32 4294901760, %v3046_v7  ;;  %v3057_v25 = vsub.f32 %v1485_v6, %v3048_v8 }
 0x1f5   :  { %1413 = vmatpush.msrb.mxu1 %v1240_v22  ;;  %1456 = vmatpush.msrb.mxu3 %v2820_v53  ;;  %v3059_v53 = vand.u32 4294901760, %v1484_v17  ;;  %v3091_v22 = vand.u32 4294901760, %v1482_v43 }
 0x1f6   :  { %1302 = vmatpush.msra.mxu0 %v2823_v32  ;;  %1354 = vmatpush.msra.mxu2 %v2862_v48  ;;  %v1483_v32 = vld [vmem:[%s3289_s7 + $0x50] sm:$0xff]  ;;  %v1549_v56 = vsub.f32 %v3046_v7, %v1548_v18  ;;  %v1554_v0 = vand.u32 4294901760, %v3057_v25 }
 0x1f7   :  { %1417 = vmatpush.msrb.mxu1 %v3306_v21  ;;  %1458 = vmatpush.msrb.mxu3 %v2834_v9  ;;  %v3072_v9 = vsub.f32 %v1484_v17, %v3059_v53  ;;  %v3105_v45 = vsub.f32 %v1482_v43, %v3091_v22  ;;  %v1476_v21 = vld [vmem:[%s3289_s7 + $0x18] sm:$0xff]  ;;  %v1598_v43 = vand.u32 4294901760, %v1597_v51 }
 0x1f8   :  { %1305 = vmatpush.msra.mxu0 %v2837_v10  ;;  %1356 = vmatpush.msra.mxu2 %v2873_v30  ;;  %v3074_v10 = vand.u32 4294901760, %v1483_v32 }
 0x1f9   :  { %1421 = vmatpush.msrb.mxu1 %v3307_v39  ;;  %1460 = vmatpush.msrb.mxu3 %v2850_v2  ;;  %v1550_v2 = vand.u32 4294901760, %v1549_v56  ;;  %v1572_v63 = vand.u32 4294901760, %v3105_v45  ;;  %v1591_v39 = vsub.f32 %v3146_v34, %v1590_v28  ;;  %v1474_v56 = vld [vmem:[%s3289_s7 + $0x8] sm:$0xff] }
 0x1fa   :  { %1308 = vmatpush.msra.mxu0 %v2853_v60  ;;  %1358 = vmatpush.msra.mxu2 %v2889_v4  ;;  %v1555_v60 = vsub.f32 %v3057_v25, %v1554_v0 }
 0x1fb   :  { %1425 = vmatpush.msrb.mxu1 %v3308_v41  ;;  %1462 = vmatpush.msrb.mxu3 %v2862_v48  ;;  %v1560_v48 = vand.u32 4294901760, %v3072_v9  ;;  %v1573_v49 = vsub.f32 %v3105_v45, %v1572_v63  ;;  %v3174_v41 = vand.u32 4294901760, %v1476_v21 }
 0x1fc   :  { %1362 = vmatmul.f32.vlgmr.msra.gmra.mxu2 %v1165_v36  ;;  %1311 = vmatpush.msra.mxu0 %v2865_v37  ;;  %v3087_v37 = vsub.f32 %v1483_v32, %v3074_v10 }
 0x1fd   :  { %1429 = vmatpush.msrb.mxu1 %v3309_v44  ;;  %1464 = vmatpush.msrb.mxu3 %v2873_v30  ;;  %v1481_v30 = vld [vmem:[%s3289_s7 + $0x40] sm:$0xff]  ;;  %v1475_v44 = vld [vmem:[%s3289_s7 + $0x10] sm:$0xff]  ;;  %v3189_v6 = vsub.f32 %v1476_v21, %v3174_v41 }
 0x1fe   :  { %1431 = vmatmul.f32.vlgmr.msrb.gmra.mxu1 %v2916_v24  ;;  %1314 = vmatpush.msra.mxu0 %v2876_v38  ;;  %v1556_v38 = vand.u32 4294901760, %v1555_v60  ;;  %v3191_v17 = vand.u32 4294901760, %v1475_v44 }
 0x1ff   :  { %1466 = vmatpush.msrb.mxu3 %v2889_v4  ;;  %1539 = vmatpush.msrb.mxu2 %v1538_v42  ;;  %v1561_v4 = vsub.f32 %v3072_v9, %v1560_v48  ;;  %v3179_v42 = vsub.f32 %v1477_v46, %v3164_v35 }
 0x200   :  { %1468 = vmatmul.f32.vlgmr.msrb.gmra.mxu3 %v2916_v24  ;;  %1317 = vmatpush.msra.mxu0 %v2892_v12  ;;  %v1566_v12 = vand.u32 4294901760, %v3087_v37  ;;  %v1584_v24 = vand.u32 4294901760, %v3128_v47  ;;  %v3202_v60 = vsub.f32 %v1475_v44, %v3191_v17 }
 0x201   :  { %1545 = vmatpush.msrb.mxu2 %v1544_v50  ;;  %1637 = vmatpush.msra.mxu1 %v2975_v1  ;;  %v1562_v59 = vand.u32 4294901760, %v1561_v4  ;;  %v1592_v50 = vand.u32 4294901760, %v1591_v39  ;;  %v1602_v32 = vand.u32 4294901760, %v3179_v42  ;;  %v1473_v4 = vld [vmem:[%s3289_s7] sm:$0xff] }
 0x202   :  { %1320 = vmatpush.msra.mxu0 %v2900_v31  ;;  %1690 = vmatpush.msra.mxu3 %v2960_v62  ;;  %v3101_v31 = vand.u32 4294901760, %v1481_v30  ;;  %v1567_v15 = vsub.f32 %v3087_v37, %v1566_v12  ;;  %v1585_v11 = vsub.f32 %v3128_v47, %v1584_v24  ;;  %v3220_v61 = vand.u32 4294901760, %v1473_v4 }
 0x203   :  { %1323 = vmatmul.f32.vlgmr.msra.gmra.mxu0 %v2923_v29  ;;  %1640 = vmatpush.msra.mxu1 %v2983_v57  ;;  %v1574_v29 = vand.u32 4294901760, %v1573_v49 }
 0x204   :  { %1494 = vmatpush.msrb.mxu0 %v2960_v62  ;;  %1692 = vmatpush.msra.mxu3 %v2967_v19  ;;  %v3116_v16 = vsub.f32 %v1481_v30, %v3101_v31  ;;  %v1568_v13 = vand.u32 4294901760, %v1567_v15  ;;  %v1586_v23 = vand.u32 4294901760, %v1585_v11  ;;  %v3204_v30 = vand.u32 4294901760, %v1474_v56 }
 0x205   :  { %1643 = vmatpush.msra.mxu1 %v3046_v7  ;;  %1551 = vmatpush.msrb.mxu2 %v1550_v2  ;;  %v1608_v2 = vand.u32 4294901760, %v3189_v6 }
 0x206   :  { %1496 = vmatpush.msrb.mxu0 %v2967_v19  ;;  %1694 = vmatpush.msra.mxu3 %v3040_v52  ;;  %v1578_v26 = vand.u32 4294901760, %v3116_v16  ;;  %v1619_v15 = vsub.f32 %v1474_v56, %v3204_v30 }
 0x207   :  { %1646 = vmatpush.msra.mxu1 %v3057_v25  ;;  %1557 = vmatpush.msrb.mxu2 %v1556_v38  ;;  %v1603_v38 = vsub.f32 %v3179_v42, %v1602_v32  ;;  %v1609_v58 = vsub.f32 %v3189_v6, %v1608_v2 }
 0x208   :  { %1498 = vmatpush.msrb.mxu0 %v3040_v52  ;;  %1696 = vmatpush.msra.mxu3 %v3048_v8  ;;  %v1579_v54 = vsub.f32 %v3116_v16, %v1578_v26 }
 0x209   :  { %1649 = vmatpush.msra.mxu1 %v3072_v9  ;;  %1563 = vmatpush.msrb.mxu2 %v1562_v59  ;;  %v1614_v59 = vand.u32 4294901760, %v3202_v60  ;;  %v1610_v49 = vand.u32 4294901760, %v1609_v58 }
 0x20a   :  { %1500 = vmatpush.msrb.mxu0 %v3048_v8  ;;  %1698 = vmatpush.msra.mxu3 %v3059_v53  ;;  %v1580_v36 = vand.u32 4294901760, %v1579_v54  ;;  %v1620_v54 = vand.u32 4294901760, %v1619_v15 }
 0x20b   :  { %1652 = vmatpush.msra.mxu1 %v3087_v37  ;;  %1569 = vmatpush.msrb.mxu2 %v1568_v13  ;;  %v1604_v13 = vand.u32 4294901760, %v1603_v38  ;;  %v1615_v55 = vsub.f32 %v3202_v60, %v1614_v59 }
 0x20c   :  { %1502 = vmatpush.msrb.mxu0 %v3059_v53  ;;  %1700 = vmatpush.msra.mxu3 %v3074_v10 }
 0x20d   :  { %1655 = vmatpush.msra.mxu1 %v3105_v45  ;;  %1575 = vmatpush.msrb.mxu2 %v1574_v29  ;;  %v1625_v29 = vsub.f32 %v1473_v4, %v3220_v61  ;;  %v1616_v46 = vand.u32 4294901760, %v1615_v55 }
 0x20e   :  { %1504 = vmatpush.msrb.mxu0 %v3074_v10  ;;  %1702 = vmatpush.msra.mxu3 %v3091_v22 }
 0x20f   :  { %1658 = vmatpush.msra.mxu1 %v3116_v16  ;;  %1581 = vmatpush.msrb.mxu2 %v1580_v36  ;;  %v1621_v36 = vsub.f32 %v1619_v15, %v1620_v54  ;;  %v1626_v11 = vand.u32 4294901760, %v1625_v29 }
 0x210   :  { %1506 = vmatpush.msrb.mxu0 %v3091_v22  ;;  %1704 = vmatpush.msra.mxu3 %v3101_v31 }
 0x211   :  { %1661 = vmatpush.msra.mxu1 %v3128_v47  ;;  %1587 = vmatpush.msrb.mxu2 %v1586_v23  ;;  %v1622_v21 = vand.u32 4294901760, %v1621_v36  ;;  %v1627_v23 = vsub.f32 %v1625_v29, %v1626_v11 }
 0x212   :  { %1508 = vmatpush.msrb.mxu0 %v3101_v31  ;;  %1706 = vmatpush.msra.mxu3 %v3118_v14 }
 0x213   :  { %1664 = vmatpush.msra.mxu1 %v3146_v34  ;;  %1593 = vmatpush.msrb.mxu2 %v1592_v50  ;;  %v1628_v39 = vand.u32 4294901760, %v1627_v23 }
 0x214   :  { %1510 = vmatpush.msrb.mxu0 %v3118_v14  ;;  %1708 = vmatpush.msra.mxu3 %v3130_v20 }
 0x215   :  { %1667 = vmatpush.msra.mxu1 %v3161_v33  ;;  %1599 = vmatpush.msrb.mxu2 %v1598_v43  ;;  %v2151_v33 = vld [vmem:[%s3290_s8] ss:$0 sm:$0xff] }
 0x216   :  { %1512 = vmatpush.msrb.mxu0 %v3130_v20  ;;  %1710 = vmatpush.msra.mxu3 %v3148_v27 }
 0x217   :  { %1670 = vmatpush.msra.mxu1 %v3179_v42  ;;  %1605 = vmatpush.msrb.mxu2 %v1604_v13 }
 0x218   :  { %1514 = vmatpush.msrb.mxu0 %v3148_v27  ;;  %1712 = vmatpush.msra.mxu3 %v3164_v35 }
 0x219   :  { %1673 = vmatpush.msra.mxu1 %v3189_v6  ;;  %1611 = vmatpush.msrb.mxu2 %v1610_v49 }
 0x21a   :  { %1516 = vmatpush.msrb.mxu0 %v3164_v35  ;;  %1714 = vmatpush.msra.mxu3 %v3174_v41 }
 0x21b   :  { %1676 = vmatpush.msra.mxu1 %v3202_v60  ;;  %1617 = vmatpush.msrb.mxu2 %v1616_v46 }
 0x21c   :  { %1518 = vmatpush.msrb.mxu0 %v3174_v41  ;;  %1716 = vmatpush.msra.mxu3 %v3191_v17 }
 0x21d   :  { %1679 = vmatpush.msra.mxu1 %v1619_v15  ;;  %1623 = vmatpush.msrb.mxu2 %v1622_v21 }
 0x21e   :  { %1520 = vmatpush.msrb.mxu0 %v3191_v17  ;;  %1718 = vmatpush.msra.mxu3 %v3204_v30 }
 0x21f   :  { %1682 = vmatpush.msra.mxu1 %v1625_v29  ;;  %1629 = vmatpush.msrb.mxu2 %v1628_v39 }
 0x220   :  { %1522 = vmatpush.msrb.mxu0 %v3204_v30  ;;  %1720 = vmatpush.msra.mxu3 %v3220_v61 }
 0x221   :  { %1798 = vmatpush.msra.mxu2 %v2960_v62  ;;  %v2150_v62 = vld [vmem:[%s3288_s6] ss:$0 sm:$0xff] }
 0x222   :  { %1524 = vmatpush.msrb.mxu0 %v3220_v61 }
 0x223   :  { %1800 = vmatpush.msra.mxu2 %v2967_v19 }
 0x224   :  { %1731 = vmatpush.msra.mxu0 %v1536_v5 }
 0x225   :  { %1802 = vmatpush.msra.mxu2 %v3040_v52 }
 0x226   :  { %1735 = vmatpush.msra.mxu0 %v1542_v3 }
 0x227   :  { %1804 = vmatpush.msra.mxu2 %v3048_v8 }
 0x228   :  { %1739 = vmatpush.msra.mxu0 %v1548_v18 }
 0x229   :  { %1806 = vmatpush.msra.mxu2 %v3059_v53 }
 0x22a   :  { %1743 = vmatpush.msra.mxu0 %v1554_v0 }
 0x22b   :  { %1808 = vmatpush.msra.mxu2 %v3074_v10 }
 0x22c   :  { %1747 = vmatpush.msra.mxu0 %v1560_v48 }
 0x22d   :  { %1810 = vmatpush.msra.mxu2 %v3091_v22 }
 0x22e   :  { %1751 = vmatpush.msra.mxu0 %v1566_v12 }
 0x22f   :  { %1812 = vmatpush.msra.mxu2 %v3101_v31 }
 0x230   :  { %1755 = vmatpush.msra.mxu0 %v1572_v63 }
 0x231   :  { %1814 = vmatpush.msra.mxu2 %v3118_v14 }
 0x232   :  { %1759 = vmatpush.msra.mxu0 %v1578_v26 }
 0x233   :  { %1816 = vmatpush.msra.mxu2 %v3130_v20 }
 0x234   :  { %1763 = vmatpush.msra.mxu0 %v1584_v24 }
 0x235   :  { %1818 = vmatpush.msra.mxu2 %v3148_v27 }
 0x236   :  { %1767 = vmatpush.msra.mxu0 %v1590_v28 }
 0x237   :  { %1820 = vmatpush.msra.mxu2 %v3164_v35 }
 0x238   :  { %1771 = vmatpush.msra.mxu0 %v1596_v40 }
 0x239   :  { %1822 = vmatpush.msra.mxu2 %v3174_v41 }
 0x23a   :  { %1775 = vmatpush.msra.mxu0 %v1602_v32 }
 0x23b   :  { %1824 = vmatpush.msra.mxu2 %v3191_v17 }
 0x23c   :  { %1779 = vmatpush.msra.mxu0 %v1608_v2 }
 0x23d   :  { %1826 = vmatpush.msra.mxu2 %v3204_v30 }
 0x23e   :  { %1783 = vmatpush.msra.mxu0 %v1614_v59 }
 0x23f   :  { %1828 = vmatpush.msra.mxu2 %v3220_v61 }
 0x240   :  { %1787 = vmatpush.msra.mxu0 %v1620_v54 }
 0x242   :  { %1791 = vmatpush.msra.mxu0 %v1626_v11 }
 0x258   :  { %v983_v3 = vpop.f32.mrf.mxu1 }
 0x25c   :  { %v929_v57 = vpop.f32.mrf.mxu2 }
 0x25e   :  { %v828_v1 = vpop.f32.mrf.mxu0 }
 0x25f   :  { %v829_v19 = vadd.f32 %v2150_v62, %v828_v1 }
 0x260   :  { %v1022_v7 = vpop.f32.mrf.mxu3 }
 0x261   :  { %v930_v5 = vadd.f32 %v929_v57, %v829_v19 }
 0x263   :  { %v984_v52 = vadd.f32 %v983_v3, %v930_v5 }
 0x265   :  { %v1023_v8 = vadd.f32 %v1022_v7, %v984_v52  ;;  %v1128_v53 = vpop.f32.mrf.mxu2 }
 0x268   :  { %v1091_v18 = vpop.f32.mrf.mxu0  ;;  %v1169_v9 = vpop.f32.mrf.mxu1 }
 0x269   :  { %v1092_v25 = vadd.f32 %v1091_v18, %v1023_v8 }
 0x26a   :  { %v1270_v48 = vpop.f32.mrf.mxu3 }
 0x26b   :  { %v1129_v0 = vadd.f32 %v1128_v53, %v1092_v25 }
 0x26d   :  { %v1170_v10 = vadd.f32 %v1169_v9, %v1129_v0 }
 0x26f   :  { %v1271_v37 = vadd.f32 %v1270_v48, %v1170_v10 }
 0x27b   :  { %v1432_v16 = vpop.f32.mrf.mxu1 }
 0x27f   :  { %v1363_v31 = vpop.f32.mrf.mxu2 }
 0x280   :  { %v1324_v22 = vpop.f32.mrf.mxu0 }
 0x281   :  { %v1325_v12 = vadd.f32 %v1324_v22, %v1271_v37 }
 0x283   :  { %v1364_v45 = vadd.f32 %v1363_v31, %v1325_v12  ;;  %v1469_v63 = vpop.f32.mrf.mxu3 }
 0x285   :  { %v1433_v14 = vadd.f32 %v1432_v16, %v1364_v45 }
 0x287   :  { %v1470_v26 = vadd.f32 %v1469_v63, %v1433_v14 }
 0x289   :  { %v1472_v47 = vmax.f32 %v1470_v26, 0.0 }
 0x28b   :  { %v1525_v20 = vand.u32 4294901760, %v1472_v47 }
 0x28d   :  { %v1526_v24 = vsub.f32 %v1472_v47, %v1525_v20  ;;  %1631 = vmatmul.f32.vlgmr.msrb.gmra.mxu2 %v1525_v20 }
 0x28f   :  { %v1527_v34 = vand.u32 4294901760, %v1526_v24  ;;  %1685 = vmatmul.f32.vlgmr.msra.gmra.mxu1 %v1526_v24 }
 0x291   :  { %v1528_v27 = vsub.f32 %v1526_v24, %v1527_v34  ;;  %1724 = vmatmul.f32.vlgmr.msra.gmra.mxu3 %v1527_v34 }
 0x293   :  { %v1529_v28 = vand.u32 4294901760, %v1528_v27 }
 0x295   :  { %1530 = vmatmul.f32.vlgmr.msrb.gmra.mxu0 %v1529_v28  ;;  %1830 = vmatmul.f32.vlgmr.msra.gmra.mxu2 %v1525_v20 }
 0x29d   :  { %1793 = vmatmul.f32.vlgmr.msra.gmra.mxu0 %v1525_v20 }
 0x30c   :  { %v1686_v44 = vpop.f32.mrf.mxu1 }
 0x310   :  { %v1632_v35 = vpop.f32.mrf.mxu2 }
 0x312   :  { %v1531_v40 = vpop.f32.mrf.mxu0 }
 0x313   :  { %v1532_v41 = vadd.f32 %v2151_v33, %v1531_v40 }
 0x314   :  { %v1725_v51 = vpop.f32.mrf.mxu3 }
 0x315   :  { %v1633_v42 = vadd.f32 %v1632_v35, %v1532_v41 }
 0x317   :  { %v1687_v50 = vadd.f32 %v1686_v44, %v1633_v42 }
 0x318   :  { %v1831_v56 = vpop.f32.mrf.mxu2 }
 0x319   :  { %v1726_v6 = vadd.f32 %v1725_v51, %v1687_v50 }
 0x31a   :  { %v1794_v17 = vpop.f32.mrf.mxu0 }
 0x31b   :  { %v1795_v32 = vadd.f32 %v1794_v17, %v1726_v6 }
 0x31d   :  { %v1832_v43 = vadd.f32 %v1831_v56, %v1795_v32 }
 0x31f   :  { %1834 = vst [vmem:[%s3291_s9] sm:$0xff] %v1832_v43 }
 0x320   :  { %1839 = vsyncpa [#allocation3], 1 }

</bundles_post_ra>
